<compile_context>
chip_gen: v6e
topology: v6e:2x2x1
jax: 0.10.0
libtpu: 0.0.40
codegen_flags: <defaults>
</compile_context>

<pallas_src>
import functools

import jax
import jax.numpy as jnp
import numpy as np
from jax.experimental import pallas as pl
from jax.experimental.pallas import tpu as pltpu


def _round_up(x, m):
    return (x + m - 1) // m * m


def _mha_kernel(xq_ref, xkv_ref, wq_ref, wk_ref, wv_ref,
                bq_ref, bk_ref, bv_ref, wo_ref, bo_ref,
                o_ref, k_sc, v_sc, q_sc, *, n_heads):
    # xq_ref:  (1, TQ, Cp)   query block of x
    # xkv_ref: (1, T,  Cp)   full sequence of x (for K/V projection)
    # wq/wk/wv_ref: (H, Cp, hd)   per-head projection weights ([in, out])
    # bq/bk/bv_ref: (H, 1, hd)
    # wo_ref:  (H, hd, Cp)   output projection, head-major rows
    # bo_ref:  (1, Cp)
    # o_ref:   (1, TQ, Cp)
    # k_sc/v_sc: VMEM (H, T, hd) scratch — K/V cache for the current batch elem
    # q_sc:      VMEM (H, TQ, hd) scratch — head-major Q staging
    qi = pl.program_id(1)

    # ---- K/V projection for the whole sequence: once per batch element. ----
    # Each head is a full-contraction 2D MXU matmul written directly into the
    # head-major scratch layout (no activation reshape/transpose/concat).
    @pl.when(qi == 0)
    def _():
        x_kv = xkv_ref[0]                                            # (T, Cp)
        for h in range(n_heads):                                     # unrolled
            k_sc[h] = (jnp.dot(x_kv, wk_ref[h],
                               preferred_element_type=jnp.float32)
                       + bk_ref[h]).astype(k_sc.dtype)
            v_sc[h] = (jnp.dot(x_kv, wv_ref[h],
                               preferred_element_type=jnp.float32)
                       + bv_ref[h]).astype(v_sc.dtype)

    # ---- Q projection for this query block (softmax scale pre-folded). ----
    x_q = xq_ref[0]                                                  # (TQ, Cp)
    for h in range(n_heads):                                         # unrolled
        q_sc[h] = (jnp.dot(x_q, wq_ref[h],
                           preferred_element_type=jnp.float32)
                   + bq_ref[h]).astype(q_sc.dtype)

    # ---- Attention core: batched over heads, no k.T, f32 accumulation. ----
    s = jnp.einsum('htd,hsd->hts', q_sc[...], k_sc[...],
                   preferred_element_type=jnp.float32)               # (H,TQ,T)
    m = jnp.max(s, axis=-1, keepdims=True)
    p = jnp.exp(s - m)
    l = jnp.sum(p, axis=-1, keepdims=True)
    p = p * pl.reciprocal(l, approx=False)        # exact: matches F.softmax

    ctx = jnp.einsum('hts,hsd->htd', p.astype(v_sc.dtype), v_sc[...],
                     preferred_element_type=jnp.float32)             # (H,TQ,hd)

    # ---- Output projection: head-concat folded into the contraction. ----
    part = jnp.einsum('htd,hdc->htc', ctx.astype(wo_ref.dtype), wo_ref[...],
                      preferred_element_type=jnp.float32)            # (H,TQ,Cp)
    out = jnp.sum(part, axis=0) + bo_ref[...]                        # (TQ, Cp)
    o_ref[0] = out.astype(o_ref.dtype)


def multi_head_attention(x, wqkv, bqkv, wout, bout, *, n_heads):
    """x: (B, T, C); wqkv: (C, 3C) [in,out]; bqkv: (3C,); wout: (C, C) [in,out]; bout: (C,)."""
    B, T, C = x.shape
    hd = C // n_heads
    assert hd * n_heads == C, "d_model must be divisible by n_heads"

    # ---------------- host-side, one-time weight repack ----------------
    # PyTorch semantics: qkv output col = h*3*hd + {0:q,1:k,2:v}*hd + d.
    scale = float(hd) ** (-0.5)
    w4 = wqkv.reshape(C, n_heads, 3, hd)
    wq = jnp.transpose(w4[:, :, 0, :], (1, 0, 2)) * scale            # (H, C, hd)
    wk = jnp.transpose(w4[:, :, 1, :], (1, 0, 2))
    wv = jnp.transpose(w4[:, :, 2, :], (1, 0, 2))
    b3 = bqkv.reshape(n_heads, 3, hd)
    bq = (b3[:, 0, :] * scale).reshape(n_heads, 1, hd)               # scale folded in
    bk = b3[:, 1, :].reshape(n_heads, 1, hd)
    bv = b3[:, 2, :].reshape(n_heads, 1, hd)
    # out_proj input rows are the head-major concatenated context.
    wo = wout.reshape(n_heads, hd, C)                                # (H, hd, C)
    bo = bout.reshape(1, C)

    # -------- lane padding: keep x loads and the output store lane-dense --------
    Cp = _round_up(C, 128)
    if Cp != C:
        pad = Cp - C
        x = jnp.pad(x, ((0, 0), (0, 0), (0, pad)))
        wq = jnp.pad(wq, ((0, 0), (0, pad), (0, 0)))                 # zero rows: exact
        wk = jnp.pad(wk, ((0, 0), (0, pad), (0, 0)))
        wv = jnp.pad(wv, ((0, 0), (0, pad), (0, 0)))
        wo = jnp.pad(wo, ((0, 0), (0, 0), (0, pad)))                 # zero output cols
        bo = jnp.pad(bo, ((0, 0), (0, pad)))

    dt = x.dtype
    H = n_heads

    # -------- query tiling --------
    if T % 128 == 0:
        TQ = 256 if T % 256 == 0 else 128
    else:
        TQ = T                       # small / ragged T: one query block per batch
    nQ = T // TQ
    grid = (B, nQ)

    # -------- VMEM budget (weights are double-buffered by BlockSpec) --------
    itemsize = jnp.dtype(dt).itemsize
    param_bytes = sum(int(a.size) * jnp.dtype(a.dtype).itemsize
                      for a in (wq, wk, wv, bq, bk, bv, wo, bo))
    block_bytes = (TQ * Cp + T * Cp + TQ * Cp) * itemsize            # xq + xkv + out
    scratch_bytes = (2 * T + TQ) * H * hd * itemsize                 # K/V/Q scratch
    score_bytes = H * TQ * T * 4                                     # f32 scores
    vmem_est = 2 * (param_bytes + block_bytes) + scratch_bytes + 2 * score_bytes + (4 << 20)
    vmem_limit = int(min(max(vmem_est, 16 << 20), 64 << 20))         # valid on v7x too

    kernel = functools.partial(_mha_kernel, n_heads=n_heads)

    out = pl.pallas_call(
        kernel,
        out_shape=jax.ShapeDtypeStruct((B, T, Cp), dt),
        grid_spec=pltpu.PrefetchScalarGridSpec(
            num_scalar_prefetch=0,
            grid=grid,
            in_specs=[
                pl.BlockSpec((1, TQ, Cp), lambda b, qi: (b, qi, 0)),   # x (query block)
                pl.BlockSpec((1, T, Cp), lambda b, qi: (b, 0, 0)),     # x (full seq for K/V)
                pl.BlockSpec((H, Cp, hd), lambda b, qi: (0, 0, 0)),    # wq (grid-invariant)
                pl.BlockSpec((H, Cp, hd), lambda b, qi: (0, 0, 0)),    # wk
                pl.BlockSpec((H, Cp, hd), lambda b, qi: (0, 0, 0)),    # wv
                pl.BlockSpec((H, 1, hd), lambda b, qi: (0, 0, 0)),     # bq
                pl.BlockSpec((H, 1, hd), lambda b, qi: (0, 0, 0)),     # bk
                pl.BlockSpec((H, 1, hd), lambda b, qi: (0, 0, 0)),     # bv
                pl.BlockSpec((H, hd, Cp), lambda b, qi: (0, 0, 0)),    # wout
                pl.BlockSpec((1, Cp), lambda b, qi: (0, 0)),           # bout
            ],
            out_specs=pl.BlockSpec((1, TQ, Cp), lambda b, qi: (b, qi, 0)),
            scratch_shapes=[
                pltpu.VMEM((H, T, hd), dt),    # K cache (per batch element)
                pltpu.VMEM((H, T, hd), dt),    # V cache
                pltpu.VMEM((H, TQ, hd), dt),   # head-major Q staging
            ],
        ),
        # Batch axis is parallel (megacore / v7x 2-TC sharding); the query-block
        # axis must stay "arbitrary" because later q-blocks of the same batch
        # reuse the K/V scratch filled at qi == 0.
        compiler_params=pltpu.CompilerParams(
            dimension_semantics=("parallel", "arbitrary"),
            vmem_limit_bytes=vmem_limit,
        ),
    )(x, x, wq, wk, wv, bq, bk, bv, wo, bo)

    return out[..., :C] if Cp != C else out


def _reference_mha(x, wqkv, bqkv, wout, bout, *, n_heads):
    """Pure-JAX reference mirroring the PyTorch forward exactly."""
    B, T, C = x.shape
    hd = C // n_heads
    qkv = x @ wqkv + bqkv                                   # (B, T, 3C)
    qkv = qkv.reshape(B, T, n_heads, 3 * hd)
    qkv = jnp.transpose(qkv, (0, 2, 1, 3))                  # (B, H, T, 3hd)
    q, k, v = qkv[..., :hd], qkv[..., hd:2 * hd], qkv[..., 2 * hd:]
    attn = (q @ jnp.swapaxes(k, -2, -1)) * (hd ** -0.5)
    attn = jax.nn.softmax(attn, axis=-1)
    out = attn @ v                                          # (B, H, T, hd)
    out = jnp.transpose(out, (0, 2, 1, 3)).reshape(B, T, C)
    return out @ wout + bout


if __name__ == "__main__":
    B, T, d_model, n_heads = 2, 8, 32, 4

    key = jax.random.PRNGKey(0)
    kx, k1, k2, k3, k4 = jax.random.split(key, 5)

    bound = 1.0 / np.sqrt(d_model)
    wqkv = jax.random.uniform(k1, (d_model, 3 * d_model), jnp.float32, -bound, bound)
    bqkv = jax.random.uniform(k2, (3 * d_model,), jnp.float32, -bound, bound)
    wout = jax.random.uniform(k3, (d_model, d_model), jnp.float32, -bound, bound)
    bout = jax.random.uniform(k4, (d_model,), jnp.float32, -bound, bound)

    x = jax.random.normal(kx, (B, T, d_model), jnp.float32)

    out = multi_head_attention(x, wqkv, bqkv, wout, bout, n_heads=n_heads)
    out = jax.block_until_ready(out)

    ref = _reference_mha(x, wqkv, bqkv, wout, bout, n_heads=n_heads)
    np.testing.assert_allclose(np.asarray(out), np.asarray(ref), rtol=1e-4, atol=1e-4)

    print("KERNEL_OK")
</pallas_src>

<mosaic_0001>
module attributes {stable_mosaic.version = 11 : i64} {
  func.func @_mha_kernel(%arg0: i32, %arg1: i32, %arg2: memref<1x8x128xf32, #tpu.memory_space<vmem>>, %arg3: memref<1x8x128xf32, #tpu.memory_space<vmem>>, %arg4: memref<4x128x8xf32, #tpu.memory_space<vmem>>, %arg5: memref<4x128x8xf32, #tpu.memory_space<vmem>>, %arg6: memref<4x128x8xf32, #tpu.memory_space<vmem>>, %arg7: memref<4x1x8xf32, #tpu.memory_space<vmem>>, %arg8: memref<4x1x8xf32, #tpu.memory_space<vmem>>, %arg9: memref<4x1x8xf32, #tpu.memory_space<vmem>>, %arg10: memref<4x8x128xf32, #tpu.memory_space<vmem>>, %arg11: memref<1x128xf32, #tpu.memory_space<vmem>>, %arg12: memref<1x8x128xf32, #tpu.memory_space<vmem>>, %arg13: memref<4x8x8xf32, #tpu.memory_space<vmem>>, %arg14: memref<4x8x8xf32, #tpu.memory_space<vmem>>, %arg15: memref<4x8x8xf32, #tpu.memory_space<vmem>>) attributes {dimension_semantics = [#tpu.dimension_semantics<parallel>, #tpu.dimension_semantics<arbitrary>], iteration_bounds = array<i64: 2, 1>, scalar_prefetch = 0 : i64, scratch_operands = 3 : i64, tpu.core_type = #tpu.core_type<tc>, window_params = [{transform_indices = @transform_0, window_bounds = array<i64: 1, 8, 128>}, {transform_indices = @transform_1, window_bounds = array<i64: 1, 8, 128>}, {pipeline_mode = #tpu.pipeline_mode<synchronous>, transform_indices = @transform_2, window_bounds = array<i64: 4, 128, 8>}, {pipeline_mode = #tpu.pipeline_mode<synchronous>, transform_indices = @transform_3, window_bounds = array<i64: 4, 128, 8>}, {pipeline_mode = #tpu.pipeline_mode<synchronous>, transform_indices = @transform_4, window_bounds = array<i64: 4, 128, 8>}, {pipeline_mode = #tpu.pipeline_mode<synchronous>, transform_indices = @transform_5, window_bounds = array<i64: 4, 1, 8>}, {pipeline_mode = #tpu.pipeline_mode<synchronous>, transform_indices = @transform_6, window_bounds = array<i64: 4, 1, 8>}, {pipeline_mode = #tpu.pipeline_mode<synchronous>, transform_indices = @transform_7, window_bounds = array<i64: 4, 1, 8>}, {pipeline_mode = #tpu.pipeline_mode<synchronous>, transform_indices = @transform_8, window_bounds = array<i64: 4, 8, 128>}, {pipeline_mode = #tpu.pipeline_mode<synchronous>, transform_indices = @transform_9, window_bounds = array<i64: 1, 128>}, {transform_indices = @transform_10, window_bounds = array<i64: 1, 8, 128>}]} {
    %c0_i32 = arith.constant 0 : i32
    %0 = arith.cmpi eq, %arg1, %c0_i32 : i32
    %1 = arith.extui %0 : i1 to i32
    %c0_i32_0 = arith.constant 0 : i32
    %2 = arith.cmpi ne, %1, %c0_i32_0 : i32
    scf.if %2 {
      %c0_62 = arith.constant 0 : index
      %c0_63 = arith.constant 0 : index
      %c0_64 = arith.constant 0 : index
      %69 = vector.load %arg3[%c0_62, %c0_63, %c0_64] : memref<1x8x128xf32, #tpu.memory_space<vmem>>, vector<1x8x128xf32>
      %70 = vector.shape_cast %69 : vector<1x8x128xf32> to vector<8x128xf32>
      %c0_65 = arith.constant 0 : index
      %c0_66 = arith.constant 0 : index
      %c0_67 = arith.constant 0 : index
      %71 = vector.load %arg5[%c0_65, %c0_66, %c0_67] : memref<4x128x8xf32, #tpu.memory_space<vmem>>, vector<1x128x8xf32>
      %72 = vector.shape_cast %71 : vector<1x128x8xf32> to vector<128x8xf32>
      %cst_68 = arith.constant dense<0.000000e+00> : vector<8x8xf32>
      %73 = tpu.matmul %70, %72, %cst_68 {dimension_numbers = #tpu.dot_dimension_numbers<[1], [0], [0], [1], [0, 0, 1, 1], [], []>} : vector<8x128xf32>, vector<128x8xf32>, vector<8x8xf32> -> vector<8x8xf32>
      %c0_69 = arith.constant 0 : index
      %c0_70 = arith.constant 0 : index
      %c0_71 = arith.constant 0 : index
      %74 = vector.load %arg8[%c0_69, %c0_70, %c0_71] : memref<4x1x8xf32, #tpu.memory_space<vmem>>, vector<1x1x8xf32>
      %75 = vector.shape_cast %74 : vector<1x1x8xf32> to vector<1x8xf32>
      %76 = vector.broadcast %75 : vector<1x8xf32> to vector<8x8xf32>
      %77 = arith.addf %73, %76 : vector<8x8xf32>
      %c0_72 = arith.constant 0 : index
      %c0_73 = arith.constant 0 : index
      %c0_74 = arith.constant 0 : index
      %78 = vector.load %arg13[%c0_72, %c0_73, %c0_74] : memref<4x8x8xf32, #tpu.memory_space<vmem>>, vector<1x8x8xf32>
      %79 = vector.shape_cast %78 : vector<1x8x8xf32> to vector<8x8xf32>
      %80 = vector.shape_cast %77 : vector<8x8xf32> to vector<1x8x8xf32>
      tpu.vector_store %arg13[%c0_72, %c0_73, %c0_74], %80 {strides = array<i32>} : memref<4x8x8xf32, #tpu.memory_space<vmem>>, vector<1x8x8xf32>,
      %c0_75 = arith.constant 0 : index
      %c0_76 = arith.constant 0 : index
      %c0_77 = arith.constant 0 : index
      %81 = vector.load %arg6[%c0_75, %c0_76, %c0_77] : memref<4x128x8xf32, #tpu.memory_space<vmem>>, vector<1x128x8xf32>
      %82 = vector.shape_cast %81 : vector<1x128x8xf32> to vector<128x8xf32>
      %cst_78 = arith.constant dense<0.000000e+00> : vector<8x8xf32>
      %83 = tpu.matmul %70, %82, %cst_78 {dimension_numbers = #tpu.dot_dimension_numbers<[1], [0], [0], [1], [0, 0, 1, 1], [], []>} : vector<8x128xf32>, vector<128x8xf32>, vector<8x8xf32> -> vector<8x8xf32>
      %c0_79 = arith.constant 0 : index
      %c0_80 = arith.constant 0 : index
      %c0_81 = arith.constant 0 : index
      %84 = vector.load %arg9[%c0_79, %c0_80, %c0_81] : memref<4x1x8xf32, #tpu.memory_space<vmem>>, vector<1x1x8xf32>
      %85 = vector.shape_cast %84 : vector<1x1x8xf32> to vector<1x8xf32>
      %86 = vector.broadcast %85 : vector<1x8xf32> to vector<8x8xf32>
      %87 = arith.addf %83, %86 : vector<8x8xf32>
      %c0_82 = arith.constant 0 : index
      %c0_83 = arith.constant 0 : index
      %c0_84 = arith.constant 0 : index
      %88 = vector.load %arg14[%c0_82, %c0_83, %c0_84] : memref<4x8x8xf32, #tpu.memory_space<vmem>>, vector<1x8x8xf32>
      %89 = vector.shape_cast %88 : vector<1x8x8xf32> to vector<8x8xf32>
      %90 = vector.shape_cast %87 : vector<8x8xf32> to vector<1x8x8xf32>
      tpu.vector_store %arg14[%c0_82, %c0_83, %c0_84], %90 {strides = array<i32>} : memref<4x8x8xf32, #tpu.memory_space<vmem>>, vector<1x8x8xf32>,
      %c1_85 = arith.constant 1 : index
      %c0_86 = arith.constant 0 : index
      %c0_87 = arith.constant 0 : index
      %91 = vector.load %arg5[%c1_85, %c0_86, %c0_87] : memref<4x128x8xf32, #tpu.memory_space<vmem>>, vector<1x128x8xf32>
      %92 = vector.shape_cast %91 : vector<1x128x8xf32> to vector<128x8xf32>
      %cst_88 = arith.constant dense<0.000000e+00> : vector<8x8xf32>
      %93 = tpu.matmul %70, %92, %cst_88 {dimension_numbers = #tpu.dot_dimension_numbers<[1], [0], [0], [1], [0, 0, 1, 1], [], []>} : vector<8x128xf32>, vector<128x8xf32>, vector<8x8xf32> -> vector<8x8xf32>
      %c1_89 = arith.constant 1 : index
      %c0_90 = arith.constant 0 : index
      %c0_91 = arith.constant 0 : index
      %94 = vector.load %arg8[%c1_89, %c0_90, %c0_91] : memref<4x1x8xf32, #tpu.memory_space<vmem>>, vector<1x1x8xf32>
      %95 = vector.shape_cast %94 : vector<1x1x8xf32> to vector<1x8xf32>
      %96 = vector.broadcast %95 : vector<1x8xf32> to vector<8x8xf32>
      %97 = arith.addf %93, %96 : vector<8x8xf32>
      %c1_92 = arith.constant 1 : index
      %c0_93 = arith.constant 0 : index
      %c0_94 = arith.constant 0 : index
      %98 = vector.load %arg13[%c1_92, %c0_93, %c0_94] : memref<4x8x8xf32, #tpu.memory_space<vmem>>, vector<1x8x8xf32>
      %99 = vector.shape_cast %98 : vector<1x8x8xf32> to vector<8x8xf32>
      %100 = vector.shape_cast %97 : vector<8x8xf32> to vector<1x8x8xf32>
      tpu.vector_store %arg13[%c1_92, %c0_93, %c0_94], %100 {strides = array<i32>} : memref<4x8x8xf32, #tpu.memory_space<vmem>>, vector<1x8x8xf32>,
      %c1_95 = arith.constant 1 : index
      %c0_96 = arith.constant 0 : index
      %c0_97 = arith.constant 0 : index
      %101 = vector.load %arg6[%c1_95, %c0_96, %c0_97] : memref<4x128x8xf32, #tpu.memory_space<vmem>>, vector<1x128x8xf32>
      %102 = vector.shape_cast %101 : vector<1x128x8xf32> to vector<128x8xf32>
      %cst_98 = arith.constant dense<0.000000e+00> : vector<8x8xf32>
      %103 = tpu.matmul %70, %102, %cst_98 {dimension_numbers = #tpu.dot_dimension_numbers<[1], [0], [0], [1], [0, 0, 1, 1], [], []>} : vector<8x128xf32>, vector<128x8xf32>, vector<8x8xf32> -> vector<8x8xf32>
      %c1_99 = arith.constant 1 : index
      %c0_100 = arith.constant 0 : index
      %c0_101 = arith.constant 0 : index
      %104 = vector.load %arg9[%c1_99, %c0_100, %c0_101] : memref<4x1x8xf32, #tpu.memory_space<vmem>>, vector<1x1x8xf32>
      %105 = vector.shape_cast %104 : vector<1x1x8xf32> to vector<1x8xf32>
      %106 = vector.broadcast %105 : vector<1x8xf32> to vector<8x8xf32>
      %107 = arith.addf %103, %106 : vector<8x8xf32>
      %c1_102 = arith.constant 1 : index
      %c0_103 = arith.constant 0 : index
      %c0_104 = arith.constant 0 : index
      %108 = vector.load %arg14[%c1_102, %c0_103, %c0_104] : memref<4x8x8xf32, #tpu.memory_space<vmem>>, vector<1x8x8xf32>
      %109 = vector.shape_cast %108 : vector<1x8x8xf32> to vector<8x8xf32>
      %110 = vector.shape_cast %107 : vector<8x8xf32> to vector<1x8x8xf32>
      tpu.vector_store %arg14[%c1_102, %c0_103, %c0_104], %110 {strides = array<i32>} : memref<4x8x8xf32, #tpu.memory_space<vmem>>, vector<1x8x8xf32>,
      %c2_105 = arith.constant 2 : index
      %c0_106 = arith.constant 0 : index
      %c0_107 = arith.constant 0 : index
      %111 = vector.load %arg5[%c2_105, %c0_106, %c0_107] : memref<4x128x8xf32, #tpu.memory_space<vmem>>, vector<1x128x8xf32>
      %112 = vector.shape_cast %111 : vector<1x128x8xf32> to vector<128x8xf32>
      %cst_108 = arith.constant dense<0.000000e+00> : vector<8x8xf32>
      %113 = tpu.matmul %70, %112, %cst_108 {dimension_numbers = #tpu.dot_dimension_numbers<[1], [0], [0], [1], [0, 0, 1, 1], [], []>} : vector<8x128xf32>, vector<128x8xf32>, vector<8x8xf32> -> vector<8x8xf32>
      %c2_109 = arith.constant 2 : index
      %c0_110 = arith.constant 0 : index
      %c0_111 = arith.constant 0 : index
      %114 = vector.load %arg8[%c2_109, %c0_110, %c0_111] : memref<4x1x8xf32, #tpu.memory_space<vmem>>, vector<1x1x8xf32>
      %115 = vector.shape_cast %114 : vector<1x1x8xf32> to vector<1x8xf32>
      %116 = vector.broadcast %115 : vector<1x8xf32> to vector<8x8xf32>
      %117 = arith.addf %113, %116 : vector<8x8xf32>
      %c2_112 = arith.constant 2 : index
      %c0_113 = arith.constant 0 : index
      %c0_114 = arith.constant 0 : index
      %118 = vector.load %arg13[%c2_112, %c0_113, %c0_114] : memref<4x8x8xf32, #tpu.memory_space<vmem>>, vector<1x8x8xf32>
      %119 = vector.shape_cast %118 : vector<1x8x8xf32> to vector<8x8xf32>
      %120 = vector.shape_cast %117 : vector<8x8xf32> to vector<1x8x8xf32>
      tpu.vector_store %arg13[%c2_112, %c0_113, %c0_114], %120 {strides = array<i32>} : memref<4x8x8xf32, #tpu.memory_space<vmem>>, vector<1x8x8xf32>,
      %c2_115 = arith.constant 2 : index
      %c0_116 = arith.constant 0 : index
      %c0_117 = arith.constant 0 : index
      %121 = vector.load %arg6[%c2_115, %c0_116, %c0_117] : memref<4x128x8xf32, #tpu.memory_space<vmem>>, vector<1x128x8xf32>
      %122 = vector.shape_cast %121 : vector<1x128x8xf32> to vector<128x8xf32>
      %cst_118 = arith.constant dense<0.000000e+00> : vector<8x8xf32>
      %123 = tpu.matmul %70, %122, %cst_118 {dimension_numbers = #tpu.dot_dimension_numbers<[1], [0], [0], [1], [0, 0, 1, 1], [], []>} : vector<8x128xf32>, vector<128x8xf32>, vector<8x8xf32> -> vector<8x8xf32>
      %c2_119 = arith.constant 2 : index
      %c0_120 = arith.constant 0 : index
      %c0_121 = arith.constant 0 : index
      %124 = vector.load %arg9[%c2_119, %c0_120, %c0_121] : memref<4x1x8xf32, #tpu.memory_space<vmem>>, vector<1x1x8xf32>
      %125 = vector.shape_cast %124 : vector<1x1x8xf32> to vector<1x8xf32>
      %126 = vector.broadcast %125 : vector<1x8xf32> to vector<8x8xf32>
      %127 = arith.addf %123, %126 : vector<8x8xf32>
      %c2_122 = arith.constant 2 : index
      %c0_123 = arith.constant 0 : index
      %c0_124 = arith.constant 0 : index
      %128 = vector.load %arg14[%c2_122, %c0_123, %c0_124] : memref<4x8x8xf32, #tpu.memory_space<vmem>>, vector<1x8x8xf32>
      %129 = vector.shape_cast %128 : vector<1x8x8xf32> to vector<8x8xf32>
      %130 = vector.shape_cast %127 : vector<8x8xf32> to vector<1x8x8xf32>
      tpu.vector_store %arg14[%c2_122, %c0_123, %c0_124], %130 {strides = array<i32>} : memref<4x8x8xf32, #tpu.memory_space<vmem>>, vector<1x8x8xf32>,
      %c3_125 = arith.constant 3 : index
      %c0_126 = arith.constant 0 : index
      %c0_127 = arith.constant 0 : index
      %131 = vector.load %arg5[%c3_125, %c0_126, %c0_127] : memref<4x128x8xf32, #tpu.memory_space<vmem>>, vector<1x128x8xf32>
      %132 = vector.shape_cast %131 : vector<1x128x8xf32> to vector<128x8xf32>
      %cst_128 = arith.constant dense<0.000000e+00> : vector<8x8xf32>
      %133 = tpu.matmul %70, %132, %cst_128 {dimension_numbers = #tpu.dot_dimension_numbers<[1], [0], [0], [1], [0, 0, 1, 1], [], []>} : vector<8x128xf32>, vector<128x8xf32>, vector<8x8xf32> -> vector<8x8xf32>
      %c3_129 = arith.constant 3 : index
      %c0_130 = arith.constant 0 : index
      %c0_131 = arith.constant 0 : index
      %134 = vector.load %arg8[%c3_129, %c0_130, %c0_131] : memref<4x1x8xf32, #tpu.memory_space<vmem>>, vector<1x1x8xf32>
      %135 = vector.shape_cast %134 : vector<1x1x8xf32> to vector<1x8xf32>
      %136 = vector.broadcast %135 : vector<1x8xf32> to vector<8x8xf32>
      %137 = arith.addf %133, %136 : vector<8x8xf32>
      %c3_132 = arith.constant 3 : index
      %c0_133 = arith.constant 0 : index
      %c0_134 = arith.constant 0 : index
      %138 = vector.load %arg13[%c3_132, %c0_133, %c0_134] : memref<4x8x8xf32, #tpu.memory_space<vmem>>, vector<1x8x8xf32>
      %139 = vector.shape_cast %138 : vector<1x8x8xf32> to vector<8x8xf32>
      %140 = vector.shape_cast %137 : vector<8x8xf32> to vector<1x8x8xf32>
      tpu.vector_store %arg13[%c3_132, %c0_133, %c0_134], %140 {strides = array<i32>} : memref<4x8x8xf32, #tpu.memory_space<vmem>>, vector<1x8x8xf32>,
      %c3_135 = arith.constant 3 : index
      %c0_136 = arith.constant 0 : index
      %c0_137 = arith.constant 0 : index
      %141 = vector.load %arg6[%c3_135, %c0_136, %c0_137] : memref<4x128x8xf32, #tpu.memory_space<vmem>>, vector<1x128x8xf32>
      %142 = vector.shape_cast %141 : vector<1x128x8xf32> to vector<128x8xf32>
      %cst_138 = arith.constant dense<0.000000e+00> : vector<8x8xf32>
      %143 = tpu.matmul %70, %142, %cst_138 {dimension_numbers = #tpu.dot_dimension_numbers<[1], [0], [0], [1], [0, 0, 1, 1], [], []>} : vector<8x128xf32>, vector<128x8xf32>, vector<8x8xf32> -> vector<8x8xf32>
      %c3_139 = arith.constant 3 : index
      %c0_140 = arith.constant 0 : index
      %c0_141 = arith.constant 0 : index
      %144 = vector.load %arg9[%c3_139, %c0_140, %c0_141] : memref<4x1x8xf32, #tpu.memory_space<vmem>>, vector<1x1x8xf32>
      %145 = vector.shape_cast %144 : vector<1x1x8xf32> to vector<1x8xf32>
      %146 = vector.broadcast %145 : vector<1x8xf32> to vector<8x8xf32>
      %147 = arith.addf %143, %146 : vector<8x8xf32>
      %c3_142 = arith.constant 3 : index
      %c0_143 = arith.constant 0 : index
      %c0_144 = arith.constant 0 : index
      %148 = vector.load %arg14[%c3_142, %c0_143, %c0_144] : memref<4x8x8xf32, #tpu.memory_space<vmem>>, vector<1x8x8xf32>
      %149 = vector.shape_cast %148 : vector<1x8x8xf32> to vector<8x8xf32>
      %150 = vector.shape_cast %147 : vector<8x8xf32> to vector<1x8x8xf32>
      tpu.vector_store %arg14[%c3_142, %c0_143, %c0_144], %150 {strides = array<i32>} : memref<4x8x8xf32, #tpu.memory_space<vmem>>, vector<1x8x8xf32>,
    } else {
    }
    %c0 = arith.constant 0 : index
    %c0_1 = arith.constant 0 : index
    %c0_2 = arith.constant 0 : index
    %3 = vector.load %arg2[%c0, %c0_1, %c0_2] : memref<1x8x128xf32, #tpu.memory_space<vmem>>, vector<1x8x128xf32>
    %4 = vector.shape_cast %3 : vector<1x8x128xf32> to vector<8x128xf32>
    %c0_3 = arith.constant 0 : index
    %c0_4 = arith.constant 0 : index
    %c0_5 = arith.constant 0 : index
    %5 = vector.load %arg4[%c0_3, %c0_4, %c0_5] : memref<4x128x8xf32, #tpu.memory_space<vmem>>, vector<1x128x8xf32>
    %6 = vector.shape_cast %5 : vector<1x128x8xf32> to vector<128x8xf32>
    %cst = arith.constant dense<0.000000e+00> : vector<8x8xf32>
    %7 = tpu.matmul %4, %6, %cst {dimension_numbers = #tpu.dot_dimension_numbers<[1], [0], [0], [1], [0, 0, 1, 1], [], []>} : vector<8x128xf32>, vector<128x8xf32>, vector<8x8xf32> -> vector<8x8xf32>
    %c0_6 = arith.constant 0 : index
    %c0_7 = arith.constant 0 : index
    %c0_8 = arith.constant 0 : index
    %8 = vector.load %arg7[%c0_6, %c0_7, %c0_8] : memref<4x1x8xf32, #tpu.memory_space<vmem>>, vector<1x1x8xf32>
    %9 = vector.shape_cast %8 : vector<1x1x8xf32> to vector<1x8xf32>
    %10 = vector.broadcast %9 : vector<1x8xf32> to vector<8x8xf32>
    %11 = arith.addf %7, %10 : vector<8x8xf32>
    %c0_9 = arith.constant 0 : index
    %c0_10 = arith.constant 0 : index
    %c0_11 = arith.constant 0 : index
    %12 = vector.load %arg15[%c0_9, %c0_10, %c0_11] : memref<4x8x8xf32, #tpu.memory_space<vmem>>, vector<1x8x8xf32>
    %13 = vector.shape_cast %12 : vector<1x8x8xf32> to vector<8x8xf32>
    %14 = vector.shape_cast %11 : vector<8x8xf32> to vector<1x8x8xf32>
    tpu.vector_store %arg15[%c0_9, %c0_10, %c0_11], %14 {strides = array<i32>} : memref<4x8x8xf32, #tpu.memory_space<vmem>>, vector<1x8x8xf32>,
    %c1 = arith.constant 1 : index
    %c0_12 = arith.constant 0 : index
    %c0_13 = arith.constant 0 : index
    %15 = vector.load %arg4[%c1, %c0_12, %c0_13] : memref<4x128x8xf32, #tpu.memory_space<vmem>>, vector<1x128x8xf32>
    %16 = vector.shape_cast %15 : vector<1x128x8xf32> to vector<128x8xf32>
    %cst_14 = arith.constant dense<0.000000e+00> : vector<8x8xf32>
    %17 = tpu.matmul %4, %16, %cst_14 {dimension_numbers = #tpu.dot_dimension_numbers<[1], [0], [0], [1], [0, 0, 1, 1], [], []>} : vector<8x128xf32>, vector<128x8xf32>, vector<8x8xf32> -> vector<8x8xf32>
    %c1_15 = arith.constant 1 : index
    %c0_16 = arith.constant 0 : index
    %c0_17 = arith.constant 0 : index
    %18 = vector.load %arg7[%c1_15, %c0_16, %c0_17] : memref<4x1x8xf32, #tpu.memory_space<vmem>>, vector<1x1x8xf32>
    %19 = vector.shape_cast %18 : vector<1x1x8xf32> to vector<1x8xf32>
    %20 = vector.broadcast %19 : vector<1x8xf32> to vector<8x8xf32>
    %21 = arith.addf %17, %20 : vector<8x8xf32>
    %c1_18 = arith.constant 1 : index
    %c0_19 = arith.constant 0 : index
    %c0_20 = arith.constant 0 : index
    %22 = vector.load %arg15[%c1_18, %c0_19, %c0_20] : memref<4x8x8xf32, #tpu.memory_space<vmem>>, vector<1x8x8xf32>
    %23 = vector.shape_cast %22 : vector<1x8x8xf32> to vector<8x8xf32>
    %24 = vector.shape_cast %21 : vector<8x8xf32> to vector<1x8x8xf32>
    tpu.vector_store %arg15[%c1_18, %c0_19, %c0_20], %24 {strides = array<i32>} : memref<4x8x8xf32, #tpu.memory_space<vmem>>, vector<1x8x8xf32>,
    %c2 = arith.constant 2 : index
    %c0_21 = arith.constant 0 : index
    %c0_22 = arith.constant 0 : index
    %25 = vector.load %arg4[%c2, %c0_21, %c0_22] : memref<4x128x8xf32, #tpu.memory_space<vmem>>, vector<1x128x8xf32>
    %26 = vector.shape_cast %25 : vector<1x128x8xf32> to vector<128x8xf32>
    %cst_23 = arith.constant dense<0.000000e+00> : vector<8x8xf32>
    %27 = tpu.matmul %4, %26, %cst_23 {dimension_numbers = #tpu.dot_dimension_numbers<[1], [0], [0], [1], [0, 0, 1, 1], [], []>} : vector<8x128xf32>, vector<128x8xf32>, vector<8x8xf32> -> vector<8x8xf32>
    %c2_24 = arith.constant 2 : index
    %c0_25 = arith.constant 0 : index
    %c0_26 = arith.constant 0 : index
    %28 = vector.load %arg7[%c2_24, %c0_25, %c0_26] : memref<4x1x8xf32, #tpu.memory_space<vmem>>, vector<1x1x8xf32>
    %29 = vector.shape_cast %28 : vector<1x1x8xf32> to vector<1x8xf32>
    %30 = vector.broadcast %29 : vector<1x8xf32> to vector<8x8xf32>
    %31 = arith.addf %27, %30 : vector<8x8xf32>
    %c2_27 = arith.constant 2 : index
    %c0_28 = arith.constant 0 : index
    %c0_29 = arith.constant 0 : index
    %32 = vector.load %arg15[%c2_27, %c0_28, %c0_29] : memref<4x8x8xf32, #tpu.memory_space<vmem>>, vector<1x8x8xf32>
    %33 = vector.shape_cast %32 : vector<1x8x8xf32> to vector<8x8xf32>
    %34 = vector.shape_cast %31 : vector<8x8xf32> to vector<1x8x8xf32>
    tpu.vector_store %arg15[%c2_27, %c0_28, %c0_29], %34 {strides = array<i32>} : memref<4x8x8xf32, #tpu.memory_space<vmem>>, vector<1x8x8xf32>,
    %c3 = arith.constant 3 : index
    %c0_30 = arith.constant 0 : index
    %c0_31 = arith.constant 0 : index
    %35 = vector.load %arg4[%c3, %c0_30, %c0_31] : memref<4x128x8xf32, #tpu.memory_space<vmem>>, vector<1x128x8xf32>
    %36 = vector.shape_cast %35 : vector<1x128x8xf32> to vector<128x8xf32>
    %cst_32 = arith.constant dense<0.000000e+00> : vector<8x8xf32>
    %37 = tpu.matmul %4, %36, %cst_32 {dimension_numbers = #tpu.dot_dimension_numbers<[1], [0], [0], [1], [0, 0, 1, 1], [], []>} : vector<8x128xf32>, vector<128x8xf32>, vector<8x8xf32> -> vector<8x8xf32>
    %c3_33 = arith.constant 3 : index
    %c0_34 = arith.constant 0 : index
    %c0_35 = arith.constant 0 : index
    %38 = vector.load %arg7[%c3_33, %c0_34, %c0_35] : memref<4x1x8xf32, #tpu.memory_space<vmem>>, vector<1x1x8xf32>
    %39 = vector.shape_cast %38 : vector<1x1x8xf32> to vector<1x8xf32>
    %40 = vector.broadcast %39 : vector<1x8xf32> to vector<8x8xf32>
    %41 = arith.addf %37, %40 : vector<8x8xf32>
    %c3_36 = arith.constant 3 : index
    %c0_37 = arith.constant 0 : index
    %c0_38 = arith.constant 0 : index
    %42 = vector.load %arg15[%c3_36, %c0_37, %c0_38] : memref<4x8x8xf32, #tpu.memory_space<vmem>>, vector<1x8x8xf32>
    %43 = vector.shape_cast %42 : vector<1x8x8xf32> to vector<8x8xf32>
    %44 = vector.shape_cast %41 : vector<8x8xf32> to vector<1x8x8xf32>
    tpu.vector_store %arg15[%c3_36, %c0_37, %c0_38], %44 {strides = array<i32>} : memref<4x8x8xf32, #tpu.memory_space<vmem>>, vector<1x8x8xf32>,
    %c0_39 = arith.constant 0 : index
    %c0_40 = arith.constant 0 : index
    %c0_41 = arith.constant 0 : index
    %45 = vector.load %arg15[%c0_39, %c0_40, %c0_41] : memref<4x8x8xf32, #tpu.memory_space<vmem>>, vector<4x8x8xf32>
    %c0_42 = arith.constant 0 : index
    %c0_43 = arith.constant 0 : index
    %c0_44 = arith.constant 0 : index
    %46 = vector.load %arg13[%c0_42, %c0_43, %c0_44] : memref<4x8x8xf32, #tpu.memory_space<vmem>>, vector<4x8x8xf32>
    "tpu.trace_start"() <{level = 10 : i32, message = "htd,hsd->hts"}> : () -> ()
    %cst_45 = arith.constant dense<0.000000e+00> : vector<4x8x8xf32>
    %47 = tpu.matmul %45, %46, %cst_45 {dimension_numbers = #tpu.dot_dimension_numbers<[2], [2], [1], [1], [0, 0, 0, 1, 1, 1], [0], [0]>} : vector<4x8x8xf32>, vector<4x8x8xf32>, vector<4x8x8xf32> -> vector<4x8x8xf32>
    "tpu.trace_stop"() : () -> ()
    %cst_46 = arith.constant dense<0xFF800000> : vector<4x8xf32>
    %48 = vector.multi_reduction <maximumf>, %47, %cst_46 [2] : vector<4x8x8xf32> to vector<4x8xf32>
    %49 = vector.shape_cast %48 : vector<4x8xf32> to vector<4x8x1xf32>
    %50 = vector.broadcast %49 : vector<4x8x1xf32> to vector<4x8x8xf32>
    %51 = arith.subf %47, %50 : vector<4x8x8xf32>
    %52 = math.exp %51 : vector<4x8x8xf32>
    %cst_47 = arith.constant dense<0.000000e+00> : vector<4x8xf32>
    %53 = vector.multi_reduction <add>, %52, %cst_47 [2] : vector<4x8x8xf32> to vector<4x8xf32>
    %54 = vector.shape_cast %53 : vector<4x8xf32> to vector<4x8x1xf32>
    %55 = tpu.reciprocal %54 : vector<4x8x1xf32> -> vector<4x8x1xf32>
    %56 = vector.broadcast %55 : vector<4x8x1xf32> to vector<4x8x8xf32>
    %57 = arith.mulf %52, %56 : vector<4x8x8xf32>
    %c0_48 = arith.constant 0 : index
    %c0_49 = arith.constant 0 : index
    %c0_50 = arith.constant 0 : index
    %58 = vector.load %arg14[%c0_48, %c0_49, %c0_50] : memref<4x8x8xf32, #tpu.memory_space<vmem>>, vector<4x8x8xf32>
    "tpu.trace_start"() <{level = 10 : i32, message = "hts,hsd->htd"}> : () -> ()
    %cst_51 = arith.constant dense<0.000000e+00> : vector<4x8x8xf32>
    %59 = tpu.matmul %57, %58, %cst_51 {dimension_numbers = #tpu.dot_dimension_numbers<[2], [1], [1], [2], [0, 0, 0, 1, 1, 2], [0], [0]>} : vector<4x8x8xf32>, vector<4x8x8xf32>, vector<4x8x8xf32> -> vector<4x8x8xf32>
    "tpu.trace_stop"() : () -> ()
    %c0_52 = arith.constant 0 : index
    %c0_53 = arith.constant 0 : index
    %c0_54 = arith.constant 0 : index
    %60 = vector.load %arg10[%c0_52, %c0_53, %c0_54] : memref<4x8x128xf32, #tpu.memory_space<vmem>>, vector<4x8x128xf32>
    "tpu.trace_start"() <{level = 10 : i32, message = "htd,hdc->htc"}> : () -> ()
    %cst_55 = arith.constant dense<0.000000e+00> : vector<4x8x128xf32>
    %61 = tpu.matmul %59, %60, %cst_55 {dimension_numbers = #tpu.dot_dimension_numbers<[2], [1], [1], [2], [0, 0, 0, 1, 1, 2], [0], [0]>} : vector<4x8x8xf32>, vector<4x8x128xf32>, vector<4x8x128xf32> -> vector<4x8x128xf32>
    "tpu.trace_stop"() : () -> ()
    %cst_56 = arith.constant dense<0.000000e+00> : vector<8x128xf32>
    %62 = vector.multi_reduction <add>, %61, %cst_56 [0] : vector<4x8x128xf32> to vector<8x128xf32>
    %c0_57 = arith.constant 0 : index
    %c0_58 = arith.constant 0 : index
    %63 = vector.load %arg11[%c0_57, %c0_58] : memref<1x128xf32, #tpu.memory_space<vmem>>, vector<1x128xf32>
    %64 = vector.broadcast %63 : vector<1x128xf32> to vector<8x128xf32>
    %65 = arith.addf %62, %64 : vector<8x128xf32>
    %c0_59 = arith.constant 0 : index
    %c0_60 = arith.constant 0 : index
    %c0_61 = arith.constant 0 : index
    %66 = vector.load %arg12[%c0_59, %c0_60, %c0_61] : memref<1x8x128xf32, #tpu.memory_space<vmem>>, vector<1x8x128xf32>
    %67 = vector.shape_cast %66 : vector<1x8x128xf32> to vector<8x128xf32>
    %68 = vector.shape_cast %65 : vector<8x128xf32> to vector<1x8x128xf32>
    tpu.vector_store %arg12[%c0_59, %c0_60, %c0_61], %68 {strides = array<i32>} : memref<1x8x128xf32, #tpu.memory_space<vmem>>, vector<1x8x128xf32>,
    return
  }
  func.func @transform_0(%arg0: i32, %arg1: i32) -> (i32, i32, i32) {
    %c0_i32 = arith.constant 0 : i32
    %c0_i32_0 = arith.constant 0 : i32
    return %arg0, %arg1, %c0_i32 : i32, i32, i32
  }
  func.func @transform_1(%arg0: i32, %arg1: i32) -> (i32, i32, i32) {
    %c0_i32 = arith.constant 0 : i32
    %c0_i32_0 = arith.constant 0 : i32
    %c0_i32_1 = arith.constant 0 : i32
    return %arg0, %c0_i32, %c0_i32_0 : i32, i32, i32
  }
  func.func @transform_2(%arg0: i32, %arg1: i32) -> (i32, i32, i32) {
    %c0_i32 = arith.constant 0 : i32
    %c0_i32_0 = arith.constant 0 : i32
    %c0_i32_1 = arith.constant 0 : i32
    %c0_i32_2 = arith.constant 0 : i32
    return %c0_i32, %c0_i32_0, %c0_i32_1 : i32, i32, i32
  }
  func.func @transform_3(%arg0: i32, %arg1: i32) -> (i32, i32, i32) {
    %c0_i32 = arith.constant 0 : i32
    %c0_i32_0 = arith.constant 0 : i32
    %c0_i32_1 = arith.constant 0 : i32
    %c0_i32_2 = arith.constant 0 : i32
    return %c0_i32, %c0_i32_0, %c0_i32_1 : i32, i32, i32
  }
  func.func @transform_4(%arg0: i32, %arg1: i32) -> (i32, i32, i32) {
    %c0_i32 = arith.constant 0 : i32
    %c0_i32_0 = arith.constant 0 : i32
    %c0_i32_1 = arith.constant 0 : i32
    %c0_i32_2 = arith.constant 0 : i32
    return %c0_i32, %c0_i32_0, %c0_i32_1 : i32, i32, i32
  }
  func.func @transform_5(%arg0: i32, %arg1: i32) -> (i32, i32, i32) {
    %c0_i32 = arith.constant 0 : i32
    %c0_i32_0 = arith.constant 0 : i32
    %c0_i32_1 = arith.constant 0 : i32
    %c0_i32_2 = arith.constant 0 : i32
    return %c0_i32, %c0_i32_0, %c0_i32_1 : i32, i32, i32
  }
  func.func @transform_6(%arg0: i32, %arg1: i32) -> (i32, i32, i32) {
    %c0_i32 = arith.constant 0 : i32
    %c0_i32_0 = arith.constant 0 : i32
    %c0_i32_1 = arith.constant 0 : i32
    %c0_i32_2 = arith.constant 0 : i32
    return %c0_i32, %c0_i32_0, %c0_i32_1 : i32, i32, i32
  }
  func.func @transform_7(%arg0: i32, %arg1: i32) -> (i32, i32, i32) {
    %c0_i32 = arith.constant 0 : i32
    %c0_i32_0 = arith.constant 0 : i32
    %c0_i32_1 = arith.constant 0 : i32
    %c0_i32_2 = arith.constant 0 : i32
    return %c0_i32, %c0_i32_0, %c0_i32_1 : i32, i32, i32
  }
  func.func @transform_8(%arg0: i32, %arg1: i32) -> (i32, i32, i32) {
    %c0_i32 = arith.constant 0 : i32
    %c0_i32_0 = arith.constant 0 : i32
    %c0_i32_1 = arith.constant 0 : i32
    %c0_i32_2 = arith.constant 0 : i32
    return %c0_i32, %c0_i32_0, %c0_i32_1 : i32, i32, i32
  }
  func.func @transform_9(%arg0: i32, %arg1: i32) -> (i32, i32) {
    %c0_i32 = arith.constant 0 : i32
    %c0_i32_0 = arith.constant 0 : i32
    %c0_i32_1 = arith.constant 0 : i32
    return %c0_i32, %c0_i32_0 : i32, i32
  }
  func.func @transform_10(%arg0: i32, %arg1: i32) -> (i32, i32, i32) {
    %c0_i32 = arith.constant 0 : i32
    %c0_i32_0 = arith.constant 0 : i32
    return %arg0, %arg1, %c0_i32 : i32, i32, i32
  }
}

</mosaic_0001>

<bundles_post_ra>
// kernel: tpu_custom_call.1
= control target key start
LH: loop header
LB: loop body
LE: loop exit
PB: predicated region body
PF: predicated region fallthrough
CT: control target
= control target key end

     0   :  { %s4769_s0 = inlined_call_operand.vmem [shape: f32[2,8,128], index: 0, kind: input, shape index: {}]   ;;  %s4770_s1 = inlined_call_operand.vmem [shape: f32[2,8,128], index: 1, kind: input, shape index: {}]   ;;  %s4771_s2 = inlined_call_operand.vmem [shape: f32[4,128,8], index: 2, kind: input, shape index: {}]   ;;  %s4772_s3 = inlined_call_operand.vmem [shape: f32[4,128,8], index: 3, kind: input, shape index: {}]   ;;  %s4773_s4 = inlined_call_operand.vmem [shape: f32[4,128,8], index: 4, kind: input, shape index: {}]   ;;  %s4774_s5 = inlined_call_operand.vmem [shape: f32[4,1,8], index: 5, kind: input, shape index: {}]   ;;  %s4775_s6 = inlined_call_operand.vmem [shape: f32[4,1,8], index: 6, kind: input, shape index: {}]   ;;  %s4776_s7 = inlined_call_operand.vmem [shape: f32[4,1,8], index: 7, kind: input, shape index: {}]   ;;  %s4777_s8 = inlined_call_operand.vmem [shape: f32[4,8,128], index: 8, kind: input, shape index: {}]   ;;  %s4778_s9 = inlined_call_operand.vmem [shape: f32[1,128], index: 9, kind: input, shape index: {}]   ;;  %s4779_s10 = inlined_call_operand.hbm [shape: f32[2,8,128], index: 10, kind: output, shape index: {}]  }
   0x1   :  { %4781 = sst [smem:[#allocation9_spill]] %s4769_s0 }
   0x2   :  { %15 = vsyncpa [#allocation6], 0 }
   0x3   :  { %17 = vsyncpa [#allocation6 + $0x1], 0  ;;  %s3729_s13 = smov 0   ;;  %s3731_s14 = smov 0  }
   0x4   :  { %s3733_s15 = smov 0   ;;  %s3735_s16 = smov 0  }
   0x5   :  { %s3737_s17 = smov 0   ;;  %s3739_s18 = smov 0  }
   0x6 LB: > { %s2618_s19 = sadd.s32 4294967295, %s3669_s18   ;;  %s2619_s20 = sadd.s32 4294967294, %s3669_s18   ;;  %s3669_s18 = sphi %s3739_s18, %s23_s18   ;;  %s3665_s17 = sphi %s3737_s17, %s4791_s17   ;;  %s3661_s16 = sphi %s3735_s16, %s4790_s16   ;;  %s3657_s15 = sphi %s3733_s15, %s4789_s15   ;;  %s3653_s14 = sphi %s3731_s14, %s4788_s14   ;;  %s3649_s13 = sphi %s3729_s13, %s4787_s13  }
   0x7   : > { %s35_s21 = sadd.s32 1, %s3665_s17  ;;  %s266_s22 = sadd.s32 1, %s3657_s15 }
   0x8   : > { %p37_p0 = scmp.ge.s32.totalorder %s35_s21, 2  ;;  %p276_p1 = scmp.ne.s32.totalorder %s3657_s15, %s3653_s14 }
   0x9   : > { %p277_p2 = scmp.eq.s32.totalorder %s2618_s19, 1  ;;  %p282_p3 = scmp.ne.s32.totalorder %s3653_s14, %s3649_s13 }
   0xa   : > { %s4793_s21 = smov (%p37_p0, %s35_s21), 0  ;;  %p283_p5 = scmp.eq.s32.totalorder %s2619_s20, 1 }
   0xb   : > { %4782 = sst [smem:[#allocation8_spill]] %s4793_s21  ;;  %p3769_p4 = por %p277_p2, %p276_p1 }
   0xc   : > { %s261_s24 = ssub.s32 %s3665_s17, %s4793_s21  ;;  %p2622_p6 = scmp.ge.s32.totalorder %s3669_s18, 1 }
   0xd   : > { %p264_p7 = scmp.eq.s32.totalorder %s261_s24, 0  ;;  %p3776_p8 = por %p283_p5, %p282_p3 }
   0xe   : > { %p342_p9 = scmp.lt.s32.totalorder %s3669_s18, 3 }
   0xf   : > { %s3782_s26 = scalar_select %p264_p7, %s3657_s15, %s266_s22  }
  0x10   : > { %p343_p10 = pnand %p2622_p6, %p342_p9 }
  0x11   : > { %p386_p11 = scmp.lt.s32.totalorder (!%p343_p10), %s3661_s16, 1  ;;  %s4785_s0 = sld [smem:[#allocation9_spill]] (!%p343_p10) }
  0x12   : > { %346 = sbr.rel (%p343_p10) target bundleno = 1342 (0x53e), region = 60  ;;  %s383_s19 = sand.u32 (!%p343_p10), 1, %s3653_s14  }
  0x13   : > { %s2521_s12 = scalar_lea.sflag (!%p343_p10), [#allocation6], %s383_s19  ;;  %s3673_s22 = smov (!%p343_p10), [#allocation5]  }
  0x17   : > { %v417_v0 = vld [vmem:[%s4772_s3 + $0x78] sm:$0xff]  ;;  %v3671_v2 = vmov 0.0   ;;  %v416_v3 = vld [vmem:[%s4772_s3 + $0x70] sm:$0xff]  ;;  %v415_v5 = vld [vmem:[%s4772_s3 + $0x68] sm:$0xff]  ;;  %s3872_s11 = scalar_select %p386_p11, %s3661_s16, 1  ;;  %vm3672_vm0 = vmmov 0  }
  0x18   : > { %v512_v1 = vld [vmem:[%s4773_s4 + $0x78] sm:$0xff]  ;;  %3040 = vmatprep.subr.mxu0 %v3671_v2  ;;  %3075 = vmatprep.subr.mxu1 %v3671_v2  ;;  %v511_v4 = vld [vmem:[%s4773_s4 + $0x70] sm:$0xff]  ;;  %v510_v6 = vld [vmem:[%s4773_s4 + $0x68] sm:$0xff]  ;;  %vm495_vm1 = vcmask 64512  }
  0x19   : > { %3041 = vmatpush3.msra.mxu0 %v417_v0  ;;  %3076 = vmatpush3.msra.mxu1 %v512_v1  ;;  %v414_v7 = vld [vmem:[%s4772_s3 + $0x60] sm:$0xff]  ;;  %v413_v9 = vld [vmem:[%s4772_s3 + $0x58] sm:$0xff]  ;;  %v412_v11 = vld [vmem:[%s4772_s3 + $0x50] sm:$0xff]  ;;  %s2624_s30 = sshll.u32 %s3872_s11, 3  ;;  %s3597_s11 = sshll.u32 %s3673_s22, 4  ;;  %s3598_s11 = int_to_ptr.vmem [resolvable:$false] %s3597_s11 }
  0x1a   : > { %3042 = vmatprep.subr.mxu0 %v3671_v2  ;;  %3077 = vmatprep.subr.mxu1 %v3671_v2  ;;  %v509_v8 = vld [vmem:[%s4773_s4 + $0x60] sm:$0xff]  ;;  %v508_v10 = vld [vmem:[%s4773_s4 + $0x58] sm:$0xff]  ;;  %v507_v12 = vld [vmem:[%s4773_s4 + $0x50] sm:$0xff]  ;;  %s396_s20 = scalar_lea.vmem %s4770_s1, %s2624_s30  ;;  %s392_s29 = scalar_lea.vmem %s4785_s0, %s2624_s30 }
  0x1b   : > { %3043 = vmatpush3.msra.mxu0 %v416_v3  ;;  %3078 = vmatpush3.msra.mxu1 %v511_v4  ;;  %v411_v13 = vld [vmem:[%s4772_s3 + $0x48] sm:$0xff]  ;;  %v410_v15 = vld [vmem:[%s4772_s3 + $0x40] sm:$0xff]  ;;  %v409_v17 = vld [vmem:[%s4772_s3 + $0x38] sm:$0xff]  ;;  %s2809_s30 = sshll.u32 %s3661_s16, 7  ;;  %s3599_s16 = scalar_lea.vmem %s3598_s11, 256 }
  0x1c   : > { %3044 = vmatprep.subr.mxu0 %v3671_v2  ;;  %3079 = vmatprep.subr.mxu1 %v3671_v2  ;;  %v506_v14 = vld [vmem:[%s4773_s4 + $0x48] sm:$0xff]  ;;  %v505_v16 = vld [vmem:[%s4773_s4 + $0x40] sm:$0xff]  ;;  %v504_v18 = vld [vmem:[%s4773_s4 + $0x38] sm:$0xff] }
  0x1d   : > { %3045 = vmatpush3.msra.mxu0 %v415_v5  ;;  %3080 = vmatpush3.msra.mxu1 %v510_v6  ;;  %v408_v19 = vld [vmem:[%s4772_s3 + $0x30] sm:$0xff]  ;;  %v407_v21 = vld [vmem:[%s4772_s3 + $0x28] sm:$0xff]  ;;  %v406_v23 = vld [vmem:[%s4772_s3 + $0x20] sm:$0xff] }
  0x1e   : > { %3046 = vmatprep.subr.mxu0 %v3671_v2  ;;  %3081 = vmatprep.subr.mxu1 %v3671_v2  ;;  %v503_v20 = vld [vmem:[%s4773_s4 + $0x30] sm:$0xff]  ;;  %v502_v22 = vld [vmem:[%s4773_s4 + $0x28] sm:$0xff]  ;;  %v501_v24 = vld [vmem:[%s4773_s4 + $0x20] sm:$0xff] }
  0x1f   : > { %3047 = vmatpush3.msra.mxu0 %v414_v7  ;;  %3082 = vmatpush3.msra.mxu1 %v509_v8  ;;  %v405_v25 = vld [vmem:[%s4772_s3 + $0x18] sm:$0xff]  ;;  %v404_v27 = vld [vmem:[%s4772_s3 + $0x10] sm:$0xff]  ;;  %v403_v29 = vld [vmem:[%s4772_s3 + $0x8] sm:$0xff] }
  0x20   : > { %3048 = vmatprep.subr.mxu0 %v3671_v2  ;;  %3083 = vmatprep.subr.mxu1 %v3671_v2  ;;  %v500_v26 = vld [vmem:[%s4773_s4 + $0x18] sm:$0xff]  ;;  %v499_v28 = vld [vmem:[%s4773_s4 + $0x10] sm:$0xff]  ;;  %v498_v30 = vld [vmem:[%s4773_s4 + $0x8] sm:$0xff] }
  0x21   : > { %3049 = vmatpush3.msra.mxu0 %v413_v9  ;;  %3084 = vmatpush3.msra.mxu1 %v508_v10  ;;  %v402_v31 = vld [vmem:[%s4772_s3] sm:$0xff]  ;;  %v2643_v34 = vld [vmem:[%s4772_s3 + $0xf8] sm:$0xff]  ;;  %v2642_v36 = vld [vmem:[%s4772_s3 + $0xf0] sm:$0xff] }
  0x22   : > { %3050 = vmatprep.subr.mxu0 %v3671_v2  ;;  %3085 = vmatprep.subr.mxu1 %v3671_v2  ;;  %v497_v32 = vld [vmem:[%s4773_s4] sm:$0xff]  ;;  %v2661_v35 = vld [vmem:[%s4773_s4 + $0xf8] sm:$0xff]  ;;  %v2660_v37 = vld [vmem:[%s4773_s4 + $0xf0] sm:$0xff] }
  0x23   : > { %3051 = vmatpush3.msra.mxu0 %v412_v11  ;;  %3086 = vmatpush3.msra.mxu1 %v507_v12  ;;  %v3920_v33 = vld [vmem:[%s396_s20] sm:$0xff]  ;;  %v2641_v38 = vld [vmem:[%s4772_s3 + $0xe8] sm:$0xff]  ;;  %v2639_v42 = vld [vmem:[%s4772_s3 + $0xd8] sm:$0xff]  ;;  %s2623_s20 = sshll.u32 %s383_s19, 3 }
  0x24   : > { %3052 = vmatprep.subr.mxu0 %v3671_v2  ;;  %3087 = vmatprep.subr.mxu1 %v3671_v2  ;;  %v2659_v39 = vld [vmem:[%s4773_s4 + $0xe8] sm:$0xff]  ;;  %v2640_v40 = vld [vmem:[%s4772_s3 + $0xe0] sm:$0xff]  ;;  %v2657_v43 = vld [vmem:[%s4773_s4 + $0xd8] sm:$0xff]  ;;  %s385_s24 = scalar_lea.vmem [#allocation5], %s2623_s20 }
  0x25   : > { %3053 = vmatpush3.msra.mxu0 %v411_v13  ;;  %3088 = vmatpush3.msra.mxu1 %v506_v14  ;;  %v2658_v41 = vld [vmem:[%s4773_s4 + $0xe0] sm:$0xff]  ;;  %v2638_v44 = vld [vmem:[%s4772_s3 + $0xd0] sm:$0xff]  ;;  %v2637_v46 = vld [vmem:[%s4772_s3 + $0xc8] sm:$0xff]  ;;  %s2535_s27 = sshll.u32 %s385_s24, 4  ;;  %s2536_s27 = int_to_ptr.vmem [resolvable:$true] %s2535_s27 }
  0x26   : > { %3054 = vmatprep.subr.mxu0 %v3671_v2  ;;  %3089 = vmatprep.subr.mxu1 %v3671_v2  ;;  %v2656_v45 = vld [vmem:[%s4773_s4 + $0xd0] sm:$0xff]  ;;  %v2655_v47 = vld [vmem:[%s4773_s4 + $0xc8] sm:$0xff]  ;;  %v2636_v48 = vld [vmem:[%s4772_s3 + $0xc0] sm:$0xff]  ;;  %s3593_s0 = scalar_lea.vmem %s2536_s27, 128  ;;  %p3600_p1 = scmp.lt.s32.totalorder %s2536_s27, %s3598_s11 }
  0x27   : > { %3055 = vmatpush3.msra.mxu0 %v410_v15  ;;  %3090 = vmatpush3.msra.mxu1 %v505_v16  ;;  %v2654_v49 = vld [vmem:[%s4773_s4 + $0xc0] sm:$0xff]  ;;  %v2635_v50 = vld [vmem:[%s4772_s3 + $0xb8] sm:$0xff]  ;;  %v2634_v52 = vld [vmem:[%s4772_s3 + $0xb0] sm:$0xff]  ;;  %p3594_p12 = scmp.ne.s32.totalorder %s2536_s27, %s3593_s0  ;;  %p3601_p2 = scmp.lt.s32.totalorder %s3599_s16, %s3593_s0 }
  0x28   : > { %3056 = vmatprep.subr.mxu0 %v3671_v2  ;;  %3091 = vmatprep.subr.mxu1 %v3671_v2  ;;  %v2653_v51 = vld [vmem:[%s4773_s4 + $0xb8] sm:$0xff]  ;;  %v2652_v53 = vld [vmem:[%s4773_s4 + $0xb0] sm:$0xff]  ;;  %v2633_v54 = vld [vmem:[%s4772_s3 + $0xa8] sm:$0xff] }
  0x29   : > { %3057 = vmatpush3.msra.mxu0 %v409_v17  ;;  %3092 = vmatpush3.msra.mxu1 %v504_v18  ;;  %v2651_v55 = vld [vmem:[%s4773_s4 + $0xa8] sm:$0xff]  ;;  %v2632_v56 = vld [vmem:[%s4772_s3 + $0xa0] sm:$0xff]  ;;  %v2631_v58 = vld [vmem:[%s4772_s3 + $0x98] sm:$0xff]  ;;  %p3595_p13 = pnand %p3594_p12, %p3769_p4  ;;  %p3602_p3 = por %p3601_p2, %p3600_p1 }
  0x2a   : > { %3058 = vmatprep.subr.mxu0 %v3671_v2  ;;  %3093 = vmatprep.subr.mxu1 %v3671_v2  ;;  %v2650_v57 = vld [vmem:[%s4773_s4 + $0xa0] sm:$0xff]  ;;  %v2649_v59 = vld [vmem:[%s4773_s4 + $0x98] sm:$0xff]  ;;  %v2630_v60 = vld [vmem:[%s4772_s3 + $0x90] sm:$0xff] }
  0x2b   : > { %3059 = vmatpush3.msra.mxu0 %v408_v19  ;;  %3094 = vmatpush3.msra.mxu1 %v503_v20  ;;  %v2648_v61 = vld [vmem:[%s4773_s4 + $0x90] sm:$0xff]  ;;  %v2629_v62 = vld [vmem:[%s4772_s3 + $0x88] sm:$0xff]  ;;  %v2628_v0 = vld [vmem:[%s4772_s3 + $0x80] sm:$0xff]  ;;  %p3596_p0 = pneg %p3595_p13 }
  0x2c   : > { %3060 = vmatprep.subr.mxu0 %v3671_v2  ;;  %3095 = vmatprep.subr.mxu1 %v3671_v2  ;;  %v2647_v63 = vld [vmem:[%s4773_s4 + $0x88] sm:$0xff]  ;;  %v2646_v1 = vld [vmem:[%s4773_s4 + $0x80] sm:$0xff]  ;;  %v2679_v3 = vld [vmem:[%s4772_s3 + $0x178] sm:$0xff] }
  0x2d   : > { %3061 = vmatpush3.msra.mxu0 %v407_v21  ;;  %3096 = vmatpush3.msra.mxu1 %v502_v22  ;;  %v2697_v4 = vld [vmem:[%s4773_s4 + $0x178] sm:$0xff]  ;;  %v2678_v5 = vld [vmem:[%s4772_s3 + $0x170] sm:$0xff]  ;;  %v2677_v7 = vld [vmem:[%s4772_s3 + $0x168] sm:$0xff]  ;;  %p3603_p5 = pnand %p3602_p3, %p3596_p0 }
  0x2e   : > { %3062 = vmatprep.subr.mxu0 %v3671_v2  ;;  %3097 = vmatprep.subr.mxu1 %v3671_v2  ;;  %v2696_v6 = vld [vmem:[%s4773_s4 + $0x170] sm:$0xff]  ;;  %v2695_v8 = vld [vmem:[%s4773_s4 + $0x168] sm:$0xff]  ;;  %v2676_v9 = vld [vmem:[%s4772_s3 + $0x160] sm:$0xff] }
  0x2f   : > { %3063 = vmatpush3.msra.mxu0 %v406_v23  ;;  %3098 = vmatpush3.msra.mxu1 %v501_v24  ;;  %v2694_v10 = vld [vmem:[%s4773_s4 + $0x160] sm:$0xff]  ;;  %v2675_v11 = vld [vmem:[%s4772_s3 + $0x158] sm:$0xff]  ;;  %v2674_v13 = vld [vmem:[%s4772_s3 + $0x150] sm:$0xff] }
  0x30   : > { %3064 = vmatprep.subr.mxu0 %v3671_v2  ;;  %3099 = vmatprep.subr.mxu1 %v3671_v2  ;;  %v2693_v12 = vld [vmem:[%s4773_s4 + $0x158] sm:$0xff]  ;;  %v2692_v14 = vld [vmem:[%s4773_s4 + $0x150] sm:$0xff]  ;;  %v2673_v15 = vld [vmem:[%s4772_s3 + $0x148] sm:$0xff] }
  0x31   : > { %3065 = vmatpush3.msra.mxu0 %v405_v25  ;;  %3100 = vmatpush3.msra.mxu1 %v500_v26  ;;  %v2691_v16 = vld [vmem:[%s4773_s4 + $0x148] sm:$0xff]  ;;  %v2672_v17 = vld [vmem:[%s4772_s3 + $0x140] sm:$0xff]  ;;  %v2671_v19 = vld [vmem:[%s4772_s3 + $0x138] sm:$0xff] }
  0x32   : > { %3066 = vmatprep.subr.mxu0 %v3671_v2  ;;  %3101 = vmatprep.subr.mxu1 %v3671_v2  ;;  %v2690_v18 = vld [vmem:[%s4773_s4 + $0x140] sm:$0xff]  ;;  %v2689_v20 = vld [vmem:[%s4773_s4 + $0x138] sm:$0xff]  ;;  %v2670_v21 = vld [vmem:[%s4772_s3 + $0x130] sm:$0xff] }
  0x33   : > { %3067 = vmatpush3.msra.mxu0 %v404_v27  ;;  %3102 = vmatpush3.msra.mxu1 %v499_v28  ;;  %v2688_v22 = vld [vmem:[%s4773_s4 + $0x130] sm:$0xff]  ;;  %v2669_v23 = vld [vmem:[%s4772_s3 + $0x128] sm:$0xff]  ;;  %v2668_v25 = vld [vmem:[%s4772_s3 + $0x120] sm:$0xff] }
  0x34   : > { %3068 = vmatprep.subr.mxu0 %v3671_v2  ;;  %3103 = vmatprep.subr.mxu1 %v3671_v2  ;;  %v2687_v24 = vld [vmem:[%s4773_s4 + $0x128] sm:$0xff]  ;;  %v2686_v26 = vld [vmem:[%s4773_s4 + $0x120] sm:$0xff]  ;;  %v2667_v27 = vld [vmem:[%s4772_s3 + $0x118] sm:$0xff] }
  0x35   : > { %3069 = vmatpush3.msra.mxu0 %v403_v29  ;;  %3104 = vmatpush3.msra.mxu1 %v498_v30  ;;  %v2685_v28 = vld [vmem:[%s4773_s4 + $0x118] sm:$0xff]  ;;  %v2666_v29 = vld [vmem:[%s4772_s3 + $0x110] sm:$0xff] }
  0x36   : > { %3070 = vmatprep.subr.mxu0 %v3671_v2  ;;  %3105 = vmatprep.subr.mxu1 %v3671_v2  ;;  %v2684_v30 = vld [vmem:[%s4773_s4 + $0x110] sm:$0xff] }
  0x37   : > { %3071 = vmatpush3.msra.mxu0 %v402_v31  ;;  %3072 = vmatprep.mubr.msk.f32.mxu0 %vm3672_vm0, %v3671_v2  ;;  %v2665_v31 = vld [vmem:[%s4772_s3 + $0x108] sm:$0xff] }
  0x38   : > { %3106 = vmatpush3.msra.mxu1 %v497_v32  ;;  %3073 = vmatmul.mubr.f32.vlgmr.msra.gmra.mxu0 %v3920_v33  ;;  %v2683_v32 = vld [vmem:[%s4773_s4 + $0x108] sm:$0xff] }
  0x39   : > { %3107 = vmatprep.mubr.msk.f32.mxu1 %vm3672_vm0, %v3671_v2  ;;  %3110 = vmatprep.subr.mxu0 %v3671_v2 }
  0x3a   : > { %3145 = vmatprep.subr.mxu1 %v3671_v2  ;;  %3108 = vmatmul.mubr.f32.vlgmr.msra.gmra.mxu1 %v3920_v33 }
  0x3b   : > { %3111 = vmatpush3.msra.mxu0 %v2643_v34  ;;  %3146 = vmatpush3.msra.mxu1 %v2661_v35  ;;  %v2664_v34 = vld [vmem:[%s4772_s3 + $0x100] sm:$0xff] }
  0x3c   : > { %3112 = vmatprep.subr.mxu0 %v3671_v2  ;;  %3147 = vmatprep.subr.mxu1 %v3671_v2  ;;  %v2682_v35 = vld [vmem:[%s4773_s4 + $0x100] sm:$0xff] }
  0x3d   : > { %3113 = vmatpush3.msra.mxu0 %v2642_v36  ;;  %3148 = vmatpush3.msra.mxu1 %v2660_v37  ;;  %v2715_v36 = vld [vmem:[%s4772_s3 + $0x1f8] sm:$0xff] }
  0x3e   : > { %3114 = vmatprep.subr.mxu0 %v3671_v2  ;;  %3149 = vmatprep.subr.mxu1 %v3671_v2  ;;  %v2733_v37 = vld [vmem:[%s4773_s4 + $0x1f8] sm:$0xff] }
  0x3f   : > { %3115 = vmatpush3.msra.mxu0 %v2641_v38  ;;  %3150 = vmatpush3.msra.mxu1 %v2659_v39  ;;  %v2714_v38 = vld [vmem:[%s4772_s3 + $0x1f0] sm:$0xff] }
  0x40   : > { %3116 = vmatprep.subr.mxu0 %v3671_v2  ;;  %3151 = vmatprep.subr.mxu1 %v3671_v2  ;;  %v2732_v39 = vld [vmem:[%s4773_s4 + $0x1f0] sm:$0xff] }
  0x41   : > { %3117 = vmatpush3.msra.mxu0 %v2640_v40  ;;  %3152 = vmatpush3.msra.mxu1 %v2658_v41  ;;  %v2713_v40 = vld [vmem:[%s4772_s3 + $0x1e8] sm:$0xff] }
  0x42   : > { %3118 = vmatprep.subr.mxu0 %v3671_v2  ;;  %3153 = vmatprep.subr.mxu1 %v3671_v2  ;;  %v2731_v41 = vld [vmem:[%s4773_s4 + $0x1e8] sm:$0xff] }
  0x43   : > { %3119 = vmatpush3.msra.mxu0 %v2639_v42  ;;  %3154 = vmatpush3.msra.mxu1 %v2657_v43  ;;  %v2712_v42 = vld [vmem:[%s4772_s3 + $0x1e0] sm:$0xff] }
  0x44   : > { %3120 = vmatprep.subr.mxu0 %v3671_v2  ;;  %3155 = vmatprep.subr.mxu1 %v3671_v2  ;;  %v2730_v43 = vld [vmem:[%s4773_s4 + $0x1e0] sm:$0xff] }
  0x45   : > { %3121 = vmatpush3.msra.mxu0 %v2638_v44  ;;  %3156 = vmatpush3.msra.mxu1 %v2656_v45  ;;  %v2711_v44 = vld [vmem:[%s4772_s3 + $0x1d8] sm:$0xff] }
  0x46   : > { %3122 = vmatprep.subr.mxu0 %v3671_v2  ;;  %3157 = vmatprep.subr.mxu1 %v3671_v2  ;;  %v2729_v45 = vld [vmem:[%s4773_s4 + $0x1d8] sm:$0xff] }
  0x47   : > { %3123 = vmatpush3.msra.mxu0 %v2637_v46  ;;  %3158 = vmatpush3.msra.mxu1 %v2655_v47  ;;  %v2710_v46 = vld [vmem:[%s4772_s3 + $0x1d0] sm:$0xff] }
  0x48   : > { %3124 = vmatprep.subr.mxu0 %v3671_v2  ;;  %3159 = vmatprep.subr.mxu1 %v3671_v2  ;;  %v2728_v47 = vld [vmem:[%s4773_s4 + $0x1d0] sm:$0xff] }
  0x49   : > { %3125 = vmatpush3.msra.mxu0 %v2636_v48  ;;  %3160 = vmatpush3.msra.mxu1 %v2654_v49  ;;  %v2709_v48 = vld [vmem:[%s4772_s3 + $0x1c8] sm:$0xff] }
  0x4a   : > { %3126 = vmatprep.subr.mxu0 %v3671_v2  ;;  %3161 = vmatprep.subr.mxu1 %v3671_v2  ;;  %v2727_v49 = vld [vmem:[%s4773_s4 + $0x1c8] sm:$0xff] }
  0x4b   : > { %3127 = vmatpush3.msra.mxu0 %v2635_v50  ;;  %3162 = vmatpush3.msra.mxu1 %v2653_v51  ;;  %v2708_v50 = vld [vmem:[%s4772_s3 + $0x1c0] sm:$0xff] }
  0x4c   : > { %3128 = vmatprep.subr.mxu0 %v3671_v2  ;;  %3163 = vmatprep.subr.mxu1 %v3671_v2  ;;  %v2726_v51 = vld [vmem:[%s4773_s4 + $0x1c0] sm:$0xff] }
  0x4d   : > { %3129 = vmatpush3.msra.mxu0 %v2634_v52  ;;  %3164 = vmatpush3.msra.mxu1 %v2652_v53  ;;  %v2707_v52 = vld [vmem:[%s4772_s3 + $0x1b8] sm:$0xff] }
  0x4e   : > { %3130 = vmatprep.subr.mxu0 %v3671_v2  ;;  %3165 = vmatprep.subr.mxu1 %v3671_v2  ;;  %v2725_v53 = vld [vmem:[%s4773_s4 + $0x1b8] sm:$0xff] }
  0x4f   : > { %3131 = vmatpush3.msra.mxu0 %v2633_v54  ;;  %3166 = vmatpush3.msra.mxu1 %v2651_v55  ;;  %v2706_v54 = vld [vmem:[%s4772_s3 + $0x1b0] sm:$0xff] }
  0x50   : > { %3132 = vmatprep.subr.mxu0 %v3671_v2  ;;  %3167 = vmatprep.subr.mxu1 %v3671_v2  ;;  %v2724_v55 = vld [vmem:[%s4773_s4 + $0x1b0] sm:$0xff] }
  0x51   : > { %3133 = vmatpush3.msra.mxu0 %v2632_v56  ;;  %3168 = vmatpush3.msra.mxu1 %v2650_v57  ;;  %v2705_v56 = vld [vmem:[%s4772_s3 + $0x1a8] sm:$0xff] }
  0x52   : > { %3134 = vmatprep.subr.mxu0 %v3671_v2  ;;  %3169 = vmatprep.subr.mxu1 %v3671_v2  ;;  %v2723_v57 = vld [vmem:[%s4773_s4 + $0x1a8] sm:$0xff] }
  0x53   : > { %3135 = vmatpush3.msra.mxu0 %v2631_v58  ;;  %3170 = vmatpush3.msra.mxu1 %v2649_v59  ;;  %v2704_v58 = vld [vmem:[%s4772_s3 + $0x1a0] sm:$0xff] }
  0x54   : > { %3136 = vmatprep.subr.mxu0 %v3671_v2  ;;  %3171 = vmatprep.subr.mxu1 %v3671_v2  ;;  %v2722_v59 = vld [vmem:[%s4773_s4 + $0x1a0] sm:$0xff] }
  0x55   : > { %3137 = vmatpush3.msra.mxu0 %v2630_v60  ;;  %3172 = vmatpush3.msra.mxu1 %v2648_v61  ;;  %v2703_v60 = vld [vmem:[%s4772_s3 + $0x198] sm:$0xff] }
  0x56   : > { %3138 = vmatprep.subr.mxu0 %v3671_v2  ;;  %3173 = vmatprep.subr.mxu1 %v3671_v2  ;;  %v2721_v61 = vld [vmem:[%s4773_s4 + $0x198] sm:$0xff] }
  0x57   : > { %3139 = vmatpush3.msra.mxu0 %v2629_v62  ;;  %3174 = vmatpush3.msra.mxu1 %v2647_v63  ;;  %v2702_v62 = vld [vmem:[%s4772_s3 + $0x190] sm:$0xff] }
  0x58   : > { %3140 = vmatprep.subr.mxu0 %v3671_v2  ;;  %3175 = vmatprep.subr.mxu1 %v3671_v2  ;;  %v2720_v63 = vld [vmem:[%s4773_s4 + $0x190] sm:$0xff] }
  0x59   : > { %3141 = vmatpush3.msra.mxu0 %v2628_v0  ;;  %3142 = vmatprep.mubr.msk.f32.mxu0 %vm3672_vm0, %v3671_v2  ;;  %v2701_v0 = vld [vmem:[%s4772_s3 + $0x188] sm:$0xff] }
  0x5a   : > { %3176 = vmatpush3.msra.mxu1 %v2646_v1  ;;  %3143 = vmatmul.mubr.f32.vlgmr.msra.gmra.mxu0 %v3920_v33  ;;  %v2719_v1 = vld [vmem:[%s4773_s4 + $0x188] sm:$0xff] }
  0x5b   : > { %3177 = vmatprep.mubr.msk.f32.mxu1 %vm3672_vm0, %v3671_v2  ;;  %3180 = vmatprep.subr.mxu0 %v3671_v2 }
  0x5c   : > { %3215 = vmatprep.subr.mxu1 %v3671_v2  ;;  %3178 = vmatmul.mubr.f32.vlgmr.msra.gmra.mxu1 %v3920_v33 }
  0x5d   : > { %3181 = vmatpush3.msra.mxu0 %v2679_v3  ;;  %3216 = vmatpush3.msra.mxu1 %v2697_v4  ;;  %v2700_v3 = vld [vmem:[%s4772_s3 + $0x180] sm:$0xff] }
  0x5e   : > { %3182 = vmatprep.subr.mxu0 %v3671_v2  ;;  %3217 = vmatprep.subr.mxu1 %v3671_v2  ;;  %v2718_v4 = vld [vmem:[%s4773_s4 + $0x180] sm:$0xff] }
  0x5f   : > { %3183 = vmatpush3.msra.mxu0 %v2678_v5  ;;  %3218 = vmatpush3.msra.mxu1 %v2696_v6  ;;  %v1189_v5 = vld [vmem:[%s4771_s2 + $0x78] sm:$0xff] }
  0x60   : > { %3184 = vmatprep.subr.mxu0 %v3671_v2  ;;  %3219 = vmatprep.subr.mxu1 %v3671_v2  ;;  %v2752_v6 = vld [vmem:[%s4771_s2 + $0xf8] sm:$0xff] }
  0x61   : > { %3185 = vmatpush3.msra.mxu0 %v2677_v7  ;;  %3220 = vmatpush3.msra.mxu1 %v2695_v8  ;;  %v1188_v7 = vld [vmem:[%s4771_s2 + $0x70] sm:$0xff] }
  0x62   : > { %3186 = vmatprep.subr.mxu0 %v3671_v2  ;;  %3221 = vmatprep.subr.mxu1 %v3671_v2  ;;  %v2751_v8 = vld [vmem:[%s4771_s2 + $0xf0] sm:$0xff] }
  0x63   : > { %3187 = vmatpush3.msra.mxu0 %v2676_v9  ;;  %3222 = vmatpush3.msra.mxu1 %v2694_v10  ;;  %v1187_v9 = vld [vmem:[%s4771_s2 + $0x68] sm:$0xff]  ;;  %v1186_v10 = vld [vmem:[%s4771_s2 + $0x60] sm:$0xff] }
  0x64   : > { %3188 = vmatprep.subr.mxu0 %v3671_v2  ;;  %3223 = vmatprep.subr.mxu1 %v3671_v2 }
  0x65   : > { %3189 = vmatpush3.msra.mxu0 %v2675_v11  ;;  %3224 = vmatpush3.msra.mxu1 %v2693_v12  ;;  %v2749_v11 = vld [vmem:[%s4771_s2 + $0xe0] sm:$0xff]  ;;  %v1185_v12 = vld [vmem:[%s4771_s2 + $0x58] sm:$0xff] }
  0x66   : > { %3190 = vmatprep.subr.mxu0 %v3671_v2  ;;  %3225 = vmatprep.subr.mxu1 %v3671_v2 }
  0x67   : > { %3191 = vmatpush3.msra.mxu0 %v2674_v13  ;;  %3226 = vmatpush3.msra.mxu1 %v2692_v14  ;;  %v2748_v13 = vld [vmem:[%s4771_s2 + $0xd8] sm:$0xff]  ;;  %v1184_v14 = vld [vmem:[%s4771_s2 + $0x50] sm:$0xff] }
  0x68   : > { %3192 = vmatprep.subr.mxu0 %v3671_v2  ;;  %3227 = vmatprep.subr.mxu1 %v3671_v2 }
  0x69   : > { %3193 = vmatpush3.msra.mxu0 %v2673_v15  ;;  %3228 = vmatpush3.msra.mxu1 %v2691_v16  ;;  %v2747_v15 = vld [vmem:[%s4771_s2 + $0xd0] sm:$0xff]  ;;  %v1183_v16 = vld [vmem:[%s4771_s2 + $0x48] sm:$0xff] }
  0x6a   : > { %3194 = vmatprep.subr.mxu0 %v3671_v2  ;;  %3229 = vmatprep.subr.mxu1 %v3671_v2 }
  0x6b   : > { %3195 = vmatpush3.msra.mxu0 %v2672_v17  ;;  %3230 = vmatpush3.msra.mxu1 %v2690_v18  ;;  %v2746_v17 = vld [vmem:[%s4771_s2 + $0xc8] sm:$0xff]  ;;  %v1182_v18 = vld [vmem:[%s4771_s2 + $0x40] sm:$0xff] }
  0x6c   : > { %3196 = vmatprep.subr.mxu0 %v3671_v2  ;;  %3231 = vmatprep.subr.mxu1 %v3671_v2 }
  0x6d   : > { %3197 = vmatpush3.msra.mxu0 %v2671_v19  ;;  %3232 = vmatpush3.msra.mxu1 %v2689_v20  ;;  %v2745_v19 = vld [vmem:[%s4771_s2 + $0xc0] sm:$0xff]  ;;  %v1181_v20 = vld [vmem:[%s4771_s2 + $0x38] sm:$0xff] }
  0x6e   : > { %3198 = vmatprep.subr.mxu0 %v3671_v2  ;;  %3233 = vmatprep.subr.mxu1 %v3671_v2 }
  0x6f   : > { %3199 = vmatpush3.msra.mxu0 %v2670_v21  ;;  %3234 = vmatpush3.msra.mxu1 %v2688_v22  ;;  %v2744_v21 = vld [vmem:[%s4771_s2 + $0xb8] sm:$0xff]  ;;  %v1180_v22 = vld [vmem:[%s4771_s2 + $0x30] sm:$0xff] }
  0x70   : > { %3200 = vmatprep.subr.mxu0 %v3671_v2  ;;  %3235 = vmatprep.subr.mxu1 %v3671_v2 }
  0x71   : > { %3201 = vmatpush3.msra.mxu0 %v2669_v23  ;;  %3236 = vmatpush3.msra.mxu1 %v2687_v24  ;;  %v2743_v23 = vld [vmem:[%s4771_s2 + $0xb0] sm:$0xff]  ;;  %v1179_v24 = vld [vmem:[%s4771_s2 + $0x28] sm:$0xff] }
  0x72   : > { %3202 = vmatprep.subr.mxu0 %v3671_v2  ;;  %3237 = vmatprep.subr.mxu1 %v3671_v2 }
  0x73   : > { %3203 = vmatpush3.msra.mxu0 %v2668_v25  ;;  %3238 = vmatpush3.msra.mxu1 %v2686_v26  ;;  %v2742_v25 = vld [vmem:[%s4771_s2 + $0xa8] sm:$0xff]  ;;  %v1178_v26 = vld [vmem:[%s4771_s2 + $0x20] sm:$0xff] }
  0x74   : > { %3204 = vmatprep.subr.mxu0 %v3671_v2  ;;  %3239 = vmatprep.subr.mxu1 %v3671_v2 }
  0x75   : > { %3205 = vmatpush3.msra.mxu0 %v2667_v27  ;;  %3240 = vmatpush3.msra.mxu1 %v2685_v28  ;;  %v2741_v27 = vld [vmem:[%s4771_s2 + $0xa0] sm:$0xff]  ;;  %v1177_v28 = vld [vmem:[%s4771_s2 + $0x18] sm:$0xff] }
  0x76   : > { %3206 = vmatprep.subr.mxu0 %v3671_v2  ;;  %3241 = vmatprep.subr.mxu1 %v3671_v2 }
  0x77   : > { %3207 = vmatpush3.msra.mxu0 %v2666_v29  ;;  %3242 = vmatpush3.msra.mxu1 %v2684_v30  ;;  %v2740_v29 = vld [vmem:[%s4771_s2 + $0x98] sm:$0xff]  ;;  %v1176_v30 = vld [vmem:[%s4771_s2 + $0x10] sm:$0xff] }
  0x78   : > { %3208 = vmatprep.subr.mxu0 %v3671_v2  ;;  %3243 = vmatprep.subr.mxu1 %v3671_v2 }
  0x79   : > { %3209 = vmatpush3.msra.mxu0 %v2665_v31  ;;  %3244 = vmatpush3.msra.mxu1 %v2683_v32  ;;  %v2739_v31 = vld [vmem:[%s4771_s2 + $0x90] sm:$0xff]  ;;  %v1175_v32 = vld [vmem:[%s4771_s2 + $0x8] sm:$0xff] }
  0x7a   : > { %3210 = vmatprep.subr.mxu0 %v3671_v2  ;;  %3245 = vmatprep.subr.mxu1 %v3671_v2 }
  0x7b   : > { %3211 = vmatpush3.msra.mxu0 %v2664_v34  ;;  %3212 = vmatprep.mubr.msk.f32.mxu0 %vm3672_vm0, %v3671_v2  ;;  %v2738_v34 = vld [vmem:[%s4771_s2 + $0x88] sm:$0xff] }
  0x7c   : > { %3246 = vmatpush3.msra.mxu1 %v2682_v35  ;;  %3213 = vmatmul.mubr.f32.vlgmr.msra.gmra.mxu0 %v3920_v33  ;;  %v1174_v35 = vld [vmem:[%s4771_s2] sm:$0xff] }
  0x7d   : > { %3247 = vmatprep.mubr.msk.f32.mxu1 %vm3672_vm0, %v3671_v2  ;;  %3250 = vmatprep.subr.mxu0 %v3671_v2 }
  0x7e   : > { %3285 = vmatprep.subr.mxu1 %v3671_v2  ;;  %3248 = vmatmul.mubr.f32.vlgmr.msra.gmra.mxu1 %v3920_v33 }
  0x7f   : > { %3251 = vmatpush3.msra.mxu0 %v2715_v36  ;;  %3286 = vmatpush3.msra.mxu1 %v2733_v37  ;;  %v2737_v36 = vld [vmem:[%s4771_s2 + $0x80] sm:$0xff] }
  0x80   : > { %3252 = vmatprep.subr.mxu0 %v3671_v2  ;;  %3287 = vmatprep.subr.mxu1 %v3671_v2  ;;  %v4465_v37 = vld [vmem:[%s392_s29] sm:$0xff]  ;;  %s2533_s29 = scalar_lea.hbm %s4779_s10, %s2809_s30 }
  0x81   : > { %3253 = vmatpush3.msra.mxu0 %v2714_v38  ;;  %3288 = vmatpush3.msra.mxu1 %v2732_v39  ;;  %v2770_v38 = vld [vmem:[%s4771_s2 + $0x178] sm:$0xff] }
  0x82   : > { %3254 = vmatprep.subr.mxu0 %v3671_v2  ;;  %3289 = vmatprep.subr.mxu1 %v3671_v2  ;;  %v2788_v39 = vld [vmem:[%s4771_s2 + $0x1f8] sm:$0xff] }
  0x83   : > { %3255 = vmatpush3.msra.mxu0 %v2713_v40  ;;  %3290 = vmatpush3.msra.mxu1 %v2731_v41  ;;  %v2769_v40 = vld [vmem:[%s4771_s2 + $0x170] sm:$0xff] }
  0x84   : > { %3256 = vmatprep.subr.mxu0 %v3671_v2  ;;  %3291 = vmatprep.subr.mxu1 %v3671_v2  ;;  %v2787_v41 = vld [vmem:[%s4771_s2 + $0x1f0] sm:$0xff] }
  0x85   : > { %3257 = vmatpush3.msra.mxu0 %v2712_v42  ;;  %3292 = vmatpush3.msra.mxu1 %v2730_v43  ;;  %v2768_v42 = vld [vmem:[%s4771_s2 + $0x168] sm:$0xff] }
  0x86   : > { %3258 = vmatprep.subr.mxu0 %v3671_v2  ;;  %3293 = vmatprep.subr.mxu1 %v3671_v2  ;;  %v2786_v43 = vld [vmem:[%s4771_s2 + $0x1e8] sm:$0xff] }
  0x87   : > { %3259 = vmatpush3.msra.mxu0 %v2711_v44  ;;  %3294 = vmatpush3.msra.mxu1 %v2729_v45  ;;  %v2767_v44 = vld [vmem:[%s4771_s2 + $0x160] sm:$0xff] }
  0x88   : > { %3260 = vmatprep.subr.mxu0 %v3671_v2  ;;  %3295 = vmatprep.subr.mxu1 %v3671_v2  ;;  %v2785_v45 = vld [vmem:[%s4771_s2 + $0x1e0] sm:$0xff] }
  0x89   : > { %3261 = vmatpush3.msra.mxu0 %v2710_v46  ;;  %3296 = vmatpush3.msra.mxu1 %v2728_v47  ;;  %v2766_v46 = vld [vmem:[%s4771_s2 + $0x158] sm:$0xff] }
  0x8a   : > { %3262 = vmatprep.subr.mxu0 %v3671_v2  ;;  %3297 = vmatprep.subr.mxu1 %v3671_v2  ;;  %v2784_v47 = vld [vmem:[%s4771_s2 + $0x1d8] sm:$0xff] }
  0x8b   : > { %3263 = vmatpush3.msra.mxu0 %v2709_v48  ;;  %3298 = vmatpush3.msra.mxu1 %v2727_v49  ;;  %v2765_v48 = vld [vmem:[%s4771_s2 + $0x150] sm:$0xff] }
  0x8c   : > { %3264 = vmatprep.subr.mxu0 %v3671_v2  ;;  %3299 = vmatprep.subr.mxu1 %v3671_v2  ;;  %v2783_v49 = vld [vmem:[%s4771_s2 + $0x1d0] sm:$0xff] }
  0x8d   : > { %3265 = vmatpush3.msra.mxu0 %v2708_v50  ;;  %3300 = vmatpush3.msra.mxu1 %v2726_v51  ;;  %v2764_v50 = vld [vmem:[%s4771_s2 + $0x148] sm:$0xff] }
  0x8e   : > { %3266 = vmatprep.subr.mxu0 %v3671_v2  ;;  %3301 = vmatprep.subr.mxu1 %v3671_v2  ;;  %v2782_v51 = vld [vmem:[%s4771_s2 + $0x1c8] sm:$0xff] }
  0x8f   : > { %3267 = vmatpush3.msra.mxu0 %v2707_v52  ;;  %3302 = vmatpush3.msra.mxu1 %v2725_v53  ;;  %v2763_v52 = vld [vmem:[%s4771_s2 + $0x140] sm:$0xff] }
  0x90   : > { %3268 = vmatprep.subr.mxu0 %v3671_v2  ;;  %3303 = vmatprep.subr.mxu1 %v3671_v2  ;;  %v2781_v53 = vld [vmem:[%s4771_s2 + $0x1c0] sm:$0xff] }
  0x91   : > { %3269 = vmatpush3.msra.mxu0 %v2706_v54  ;;  %3304 = vmatpush3.msra.mxu1 %v2724_v55  ;;  %v2762_v54 = vld [vmem:[%s4771_s2 + $0x138] sm:$0xff] }
  0x92   : > { %3270 = vmatprep.subr.mxu0 %v3671_v2  ;;  %3305 = vmatprep.subr.mxu1 %v3671_v2  ;;  %v2780_v55 = vld [vmem:[%s4771_s2 + $0x1b8] sm:$0xff] }
  0x93   : > { %3271 = vmatpush3.msra.mxu0 %v2705_v56  ;;  %3306 = vmatpush3.msra.mxu1 %v2723_v57  ;;  %v2761_v56 = vld [vmem:[%s4771_s2 + $0x130] sm:$0xff] }
  0x94   : > { %3272 = vmatprep.subr.mxu0 %v3671_v2  ;;  %3307 = vmatprep.subr.mxu1 %v3671_v2  ;;  %v2779_v57 = vld [vmem:[%s4771_s2 + $0x1b0] sm:$0xff] }
  0x95   : > { %3273 = vmatpush3.msra.mxu0 %v2704_v58  ;;  %3308 = vmatpush3.msra.mxu1 %v2722_v59  ;;  %v2760_v58 = vld [vmem:[%s4771_s2 + $0x128] sm:$0xff] }
  0x96   : > { %3274 = vmatprep.subr.mxu0 %v3671_v2  ;;  %3309 = vmatprep.subr.mxu1 %v3671_v2  ;;  %v2778_v59 = vld [vmem:[%s4771_s2 + $0x1a8] sm:$0xff] }
  0x97   : > { %3275 = vmatpush3.msra.mxu0 %v2703_v60  ;;  %3310 = vmatpush3.msra.mxu1 %v2721_v61  ;;  %v2759_v60 = vld [vmem:[%s4771_s2 + $0x120] sm:$0xff] }
  0x98   : > { %3276 = vmatprep.subr.mxu0 %v3671_v2  ;;  %3311 = vmatprep.subr.mxu1 %v3671_v2  ;;  %v2777_v61 = vld [vmem:[%s4771_s2 + $0x1a0] sm:$0xff] }
  0x99   : > { %3277 = vmatpush3.msra.mxu0 %v2702_v62  ;;  %3312 = vmatpush3.msra.mxu1 %v2720_v63  ;;  %v2758_v62 = vld [vmem:[%s4771_s2 + $0x118] sm:$0xff] }
  0x9a   : > { %3278 = vmatprep.subr.mxu0 %v3671_v2  ;;  %3313 = vmatprep.subr.mxu1 %v3671_v2  ;;  %v2776_v63 = vld [vmem:[%s4771_s2 + $0x198] sm:$0xff] }
  0x9b   : > { %3279 = vmatpush3.msra.mxu0 %v2701_v0  ;;  %3314 = vmatpush3.msra.mxu1 %v2719_v1  ;;  %v2757_v0 = vld [vmem:[%s4771_s2 + $0x110] sm:$0xff] }
  0x9c   : > { %3280 = vmatprep.subr.mxu0 %v3671_v2  ;;  %3315 = vmatprep.subr.mxu1 %v3671_v2  ;;  %v2775_v1 = vld [vmem:[%s4771_s2 + $0x190] sm:$0xff] }
  0x9d   : > { %3281 = vmatpush3.msra.mxu0 %v2700_v3  ;;  %3282 = vmatprep.mubr.msk.f32.mxu0 %vm3672_vm0, %v3671_v2  ;;  %v2756_v3 = vld [vmem:[%s4771_s2 + $0x108] sm:$0xff] }
  0x9e   : > { %3316 = vmatpush3.msra.mxu1 %v2718_v4  ;;  %3283 = vmatmul.mubr.f32.vlgmr.msra.gmra.mxu0 %v3920_v33  ;;  %v2774_v4 = vld [vmem:[%s4771_s2 + $0x188] sm:$0xff] }
  0x9f   : > { %3317 = vmatprep.mubr.msk.f32.mxu1 %vm3672_vm0, %v3671_v2  ;;  %3320 = vmatprep.subr.mxu0 %v3671_v2 }
  0xa0   : > { %3355 = vmatprep.subr.mxu1 %v3671_v2  ;;  %3318 = vmatmul.mubr.f32.vlgmr.msra.gmra.mxu1 %v3920_v33  ;;  %v2750_v33 = vld [vmem:[%s4771_s2 + $0xe8] sm:$0xff] }
  0xa1   : > { %3321 = vmatpush3.msra.mxu0 %v1189_v5  ;;  %3356 = vmatpush3.msra.mxu1 %v2752_v6  ;;  %v2755_v5 = vld [vmem:[%s4771_s2 + $0x100] sm:$0xff] }
  0xa2   : > { %3322 = vmatprep.subr.mxu0 %v3671_v2  ;;  %3357 = vmatprep.subr.mxu1 %v3671_v2  ;;  %v2773_v6 = vld [vmem:[%s4771_s2 + $0x180] sm:$0xff] }
  0xa3   : > { %3323 = vmatpush3.msra.mxu0 %v1188_v7  ;;  %3358 = vmatpush3.msra.mxu1 %v2751_v8  ;;  %v2626_v7 = vld [vmem:[%s4775_s6] ss:$0 sm:$0xff] }
  0xa4   : > { %3324 = vmatprep.subr.mxu0 %v3671_v2  ;;  %3359 = vmatprep.subr.mxu1 %v3671_v2 }
  0xa5   : > { %3325 = vmatpush3.msra.mxu0 %v1187_v9  ;;  %3360 = vmatpush3.msra.mxu1 %v2750_v33  ;;  %v2627_v9 = vld [vmem:[%s4776_s7] ss:$0 sm:$0xff] }
  0xa6   : > { %3326 = vmatprep.subr.mxu0 %v3671_v2  ;;  %3361 = vmatprep.subr.mxu1 %v3671_v2 }
  0xa7   : > { %3327 = vmatpush3.msra.mxu0 %v1186_v10  ;;  %3362 = vmatpush3.msra.mxu1 %v2749_v11 }
  0xa8   : > { %3328 = vmatprep.subr.mxu0 %v3671_v2  ;;  %3363 = vmatprep.subr.mxu1 %v3671_v2 }
  0xa9   : > { %3329 = vmatpush3.msra.mxu0 %v1185_v12  ;;  %3364 = vmatpush3.msra.mxu1 %v2748_v13 }
  0xaa   : > { %3330 = vmatprep.subr.mxu0 %v3671_v2  ;;  %3365 = vmatprep.subr.mxu1 %v3671_v2 }
  0xab   : > { %3331 = vmatpush3.msra.mxu0 %v1184_v14  ;;  %3366 = vmatpush3.msra.mxu1 %v2747_v15  ;;  %v2645_v15 = vld [vmem:[%s4775_s6 + $0x1] ss:$0 sm:$0xff] }
  0xac   : > { %3332 = vmatprep.subr.mxu0 %v3671_v2  ;;  %3367 = vmatprep.subr.mxu1 %v3671_v2 }
  0xad   : > { %3333 = vmatpush3.msra.mxu0 %v1183_v16  ;;  %3368 = vmatpush3.msra.mxu1 %v2746_v17  ;;  %v2663_v17 = vld [vmem:[%s4776_s7 + $0x1] ss:$0 sm:$0xff] }
  0xae   : > { %3334 = vmatprep.subr.mxu0 %v3671_v2  ;;  %3369 = vmatprep.subr.mxu1 %v3671_v2 }
  0xaf   : > { %3335 = vmatpush3.msra.mxu0 %v1182_v18  ;;  %3370 = vmatpush3.msra.mxu1 %v2745_v19 }
  0xb0   : > { %3336 = vmatprep.subr.mxu0 %v3671_v2  ;;  %3371 = vmatprep.subr.mxu1 %v3671_v2 }
  0xb1   : > { %3337 = vmatpush3.msra.mxu0 %v1181_v20  ;;  %3372 = vmatpush3.msra.mxu1 %v2744_v21 }
  0xb2   : > { %3338 = vmatprep.subr.mxu0 %v3671_v2  ;;  %3373 = vmatprep.subr.mxu1 %v3671_v2 }
  0xb3   : > { %3339 = vmatpush3.msra.mxu0 %v1180_v22  ;;  %3374 = vmatpush3.msra.mxu1 %v2743_v23 }
  0xb4   : > { %3340 = vmatprep.subr.mxu0 %v3671_v2  ;;  %3375 = vmatprep.subr.mxu1 %v3671_v2 }
  0xb5   : > { %3341 = vmatpush3.msra.mxu0 %v1179_v24  ;;  %3376 = vmatpush3.msra.mxu1 %v2742_v25  ;;  %v2681_v24 = vld [vmem:[%s4775_s6 + $0x2] ss:$0 sm:$0xff] }
  0xb6   : > { %3342 = vmatprep.subr.mxu0 %v3671_v2  ;;  %3377 = vmatprep.subr.mxu1 %v3671_v2 }
  0xb7   : > { %3343 = vmatpush3.msra.mxu0 %v1178_v26  ;;  %3378 = vmatpush3.msra.mxu1 %v2741_v27  ;;  %v2699_v26 = vld [vmem:[%s4776_s7 + $0x2] ss:$0 sm:$0xff] }
  0xb8   : > { %3344 = vmatprep.subr.mxu0 %v3671_v2  ;;  %3379 = vmatprep.subr.mxu1 %v3671_v2 }
  0xb9   : > { %3345 = vmatpush3.msra.mxu0 %v1177_v28  ;;  %3380 = vmatpush3.msra.mxu1 %v2740_v29 }
  0xba   : > { %3346 = vmatprep.subr.mxu0 %v3671_v2  ;;  %3381 = vmatprep.subr.mxu1 %v3671_v2 }
  0xbb   : > { %3347 = vmatpush3.msra.mxu0 %v1176_v30  ;;  %3382 = vmatpush3.msra.mxu1 %v2739_v31 }
  0xbc   : > { %3348 = vmatprep.subr.mxu0 %v3671_v2  ;;  %3383 = vmatprep.subr.mxu1 %v3671_v2 }
  0xbd   : > { %3349 = vmatpush3.msra.mxu0 %v1175_v32  ;;  %3384 = vmatpush3.msra.mxu1 %v2738_v34  ;;  %v2717_v32 = vld [vmem:[%s4775_s6 + $0x3] ss:$0 sm:$0xff] }
  0xbe   : > { %3350 = vmatprep.subr.mxu0 %v3671_v2  ;;  %3385 = vmatprep.subr.mxu1 %v3671_v2 }
  0xbf   : > { %3351 = vmatpush3.msra.mxu0 %v1174_v35  ;;  %3352 = vmatprep.mubr.msk.f32.mxu0 %vm3672_vm0, %v3671_v2  ;;  %v2735_v35 = vld [vmem:[%s4776_s7 + $0x3] ss:$0 sm:$0xff] }
  0xc0   : > { %3386 = vmatpush3.msra.mxu1 %v2737_v36  ;;  %3387 = vmatprep.mubr.msk.f32.mxu1 %vm3672_vm0, %v3671_v2 }
  0xc1   : > { %3353 = vmatmul.mubr.f32.vlgmr.msra.gmra.mxu0 %v4465_v37  ;;  %3388 = vmatmul.mubr.f32.vlgmr.msra.gmra.mxu1 %v4465_v37 }
  0xc2   : > { %3390 = vmatprep.subr.mxu0 %v3671_v2  ;;  %3425 = vmatprep.subr.mxu1 %v3671_v2 }
  0xc3   : > { %3391 = vmatpush3.msra.mxu0 %v2770_v38  ;;  %3426 = vmatpush3.msra.mxu1 %v2788_v39 }
  0xc4   : > { %3392 = vmatprep.subr.mxu0 %v3671_v2  ;;  %3427 = vmatprep.subr.mxu1 %v3671_v2 }
  0xc5   : > { %3393 = vmatpush3.msra.mxu0 %v2769_v40  ;;  %3428 = vmatpush3.msra.mxu1 %v2787_v41  ;;  %v2736_v41 = vld [vmem:[%s4774_s5] ss:$0 sm:$0xff] }
  0xc6   : > { %3394 = vmatprep.subr.mxu0 %v3671_v2  ;;  %3429 = vmatprep.subr.mxu1 %v3671_v2 }
  0xc7   : > { %3395 = vmatpush3.msra.mxu0 %v2768_v42  ;;  %3430 = vmatpush3.msra.mxu1 %v2786_v43  ;;  %v2754_v42 = vld [vmem:[%s4774_s5 + $0x1] ss:$0 sm:$0xff] }
  0xc8   : > { %3396 = vmatprep.subr.mxu0 %v3671_v2  ;;  %3431 = vmatprep.subr.mxu1 %v3671_v2 }
  0xc9   : > { %3397 = vmatpush3.msra.mxu0 %v2767_v44  ;;  %3432 = vmatpush3.msra.mxu1 %v2785_v45 }
  0xca   : > { %3398 = vmatprep.subr.mxu0 %v3671_v2  ;;  %3433 = vmatprep.subr.mxu1 %v3671_v2 }
  0xcb   : > { %3399 = vmatpush3.msra.mxu0 %v2766_v46  ;;  %3434 = vmatpush3.msra.mxu1 %v2784_v47 }
  0xcc   : > { %3400 = vmatprep.subr.mxu0 %v3671_v2  ;;  %3435 = vmatprep.subr.mxu1 %v3671_v2 }
  0xcd   : > { %3401 = vmatpush3.msra.mxu0 %v2765_v48  ;;  %3436 = vmatpush3.msra.mxu1 %v2783_v49 }
  0xce   : > { %3402 = vmatprep.subr.mxu0 %v3671_v2  ;;  %3437 = vmatprep.subr.mxu1 %v3671_v2 }
  0xcf   : > { %3403 = vmatpush3.msra.mxu0 %v2764_v50  ;;  %3438 = vmatpush3.msra.mxu1 %v2782_v51 }
  0xd0   : > { %3404 = vmatprep.subr.mxu0 %v3671_v2  ;;  %3439 = vmatprep.subr.mxu1 %v3671_v2 }
  0xd1   : > { %3405 = vmatpush3.msra.mxu0 %v2763_v52  ;;  %3440 = vmatpush3.msra.mxu1 %v2781_v53  ;;  %v2772_v53 = vld [vmem:[%s4774_s5 + $0x2] ss:$0 sm:$0xff] }
  0xd2   : > { %3406 = vmatprep.subr.mxu0 %v3671_v2  ;;  %3441 = vmatprep.subr.mxu1 %v3671_v2 }
  0xd3   : > { %3407 = vmatpush3.msra.mxu0 %v2762_v54  ;;  %3442 = vmatpush3.msra.mxu1 %v2780_v55  ;;  %v2790_v54 = vld [vmem:[%s4774_s5 + $0x3] ss:$0 sm:$0xff] }
  0xd4   : > { %3408 = vmatprep.subr.mxu0 %v3671_v2  ;;  %3443 = vmatprep.subr.mxu1 %v3671_v2 }
  0xd5   : > { %3409 = vmatpush3.msra.mxu0 %v2761_v56  ;;  %3444 = vmatpush3.msra.mxu1 %v2779_v57 }
  0xd6   : > { %3410 = vmatprep.subr.mxu0 %v3671_v2  ;;  %3445 = vmatprep.subr.mxu1 %v3671_v2 }
  0xd7   : > { %3411 = vmatpush3.msra.mxu0 %v2760_v58  ;;  %3446 = vmatpush3.msra.mxu1 %v2778_v59 }
  0xd8   : > { %3412 = vmatprep.subr.mxu0 %v3671_v2  ;;  %3447 = vmatprep.subr.mxu1 %v3671_v2 }
  0xd9   : > { %3413 = vmatpush3.msra.mxu0 %v2759_v60  ;;  %3448 = vmatpush3.msra.mxu1 %v2777_v61 }
  0xda   : > { %3414 = vmatprep.subr.mxu0 %v3671_v2  ;;  %3449 = vmatprep.subr.mxu1 %v3671_v2 }
  0xdb   : > { %3415 = vmatpush3.msra.mxu0 %v2758_v62  ;;  %3450 = vmatpush3.msra.mxu1 %v2776_v63 }
  0xdc   : > { %3416 = vmatprep.subr.mxu0 %v3671_v2  ;;  %3451 = vmatprep.subr.mxu1 %v3671_v2 }
  0xdd   : > { %3417 = vmatpush3.msra.mxu0 %v2757_v0  ;;  %3452 = vmatpush3.msra.mxu1 %v2775_v1 }
  0xde   : > { %3418 = vmatprep.subr.mxu0 %v3671_v2  ;;  %3453 = vmatprep.subr.mxu1 %v3671_v2 }
  0xdf   : > { %3419 = vmatpush3.msra.mxu0 %v2756_v3  ;;  %3454 = vmatpush3.msra.mxu1 %v2774_v4 }
  0xe0   : > { %3420 = vmatprep.subr.mxu0 %v3671_v2  ;;  %3455 = vmatprep.subr.mxu1 %v3671_v2 }
  0xe1   : > { %3421 = vmatpush3.msra.mxu0 %v2755_v5  ;;  %3422 = vmatprep.mubr.msk.f32.mxu0 %vm3672_vm0, %v3671_v2 }
  0xe2   : > { %3456 = vmatpush3.msra.mxu1 %v2773_v6  ;;  %3457 = vmatprep.mubr.msk.f32.mxu1 %vm3672_vm0, %v3671_v2 }
  0xe3   : > { %3423 = vmatmul.mubr.f32.vlgmr.msra.gmra.mxu0 %v4465_v37  ;;  %3458 = vmatmul.mubr.f32.vlgmr.msra.gmra.mxu1 %v4465_v37 }
  0xe4   : > { %3460 = vmatprep.subr.mxu0 %v3671_v2  ;;  %3465 = vmatprep.subr.mxu1 %v3671_v2 }
  0xe5   : > { %3462 = vmatprep.mubr.msk.f32.mxu0 %vm3672_vm0, %v3671_v2  ;;  %3467 = vmatprep.mubr.msk.f32.mxu1 %vm3672_vm0, %v3671_v2 }
  0xf8   : > { %v491_v8 = vpop.f32.mrf.mxu0 }
  0xf9   : > { %v492_v33 = vadd.f32 %v2626_v7, %v491_v8 }
  0xfa   : > { %v3074_v10 = vpop.f32.mrf.mxu0  ;;  %v586_v11 = vpop.f32.mrf.mxu1 }
  0xfb   : > { %496 = vst.msk [vmem:[#allocation2] sm:$0xff] %vm495_vm1, %v492_v33  ;;  %v587_v12 = vadd.f32 %v2627_v9, %v586_v11 }
  0xfc   : > { %v3109_v13 = vpop.f32.mrf.mxu1 }
  0xfd   : > { %590 = vst.msk [vmem:[#allocation3] sm:$0xff] %vm495_vm1, %v587_v12 }
 0x102   : > { %v1564_v14 = vld [vmem:[#allocation2] sm:$0xff] }
 0x103   : > { %3461 = vmatpush3.xpose.msk.msra.mxu0 %vm495_vm1, %v1564_v14 }
 0x104   : > { %3470 = vmatprep.subr.mxu0 %v3671_v2  ;;  %v1916_v63 = vld [vmem:[#allocation3] sm:$0xff] }
 0x11a   : > { %v682_v16 = vpop.f32.mrf.mxu0 }
 0x11b   : > { %v683_v18 = vadd.f32 %v2645_v15, %v682_v16 }
 0x11c   : > { %v3144_v19 = vpop.f32.mrf.mxu0  ;;  %v779_v20 = vpop.f32.mrf.mxu1 }
 0x11d   : > { %687 = vst.msk [vmem:[#allocation2 + $0x8] sm:$0xff] %vm495_vm1, %v683_v18  ;;  %v780_v21 = vadd.f32 %v2663_v17, %v779_v20 }
 0x11e   : > { %v3179_v22 = vpop.f32.mrf.mxu1 }
 0x11f   : > { %784 = vst.msk [vmem:[#allocation3 + $0x8] sm:$0xff] %vm495_vm1, %v780_v21 }
 0x124   : > { %v1565_v23 = vld [vmem:[#allocation2 + $0x8] sm:$0xff] }
 0x125   : > { %3466 = vmatpush3.xpose.msk.msra.mxu1 %vm495_vm1, %v1565_v23 }
 0x126   : > { %3475 = vmatprep.subr.mxu1 %v3671_v2  ;;  %v1917_v0 = vld [vmem:[#allocation3 + $0x8] sm:$0xff] }
 0x13c   : > { %v876_v25 = vpop.f32.mrf.mxu0 }
 0x13d   : > { %v877_v27 = vadd.f32 %v2681_v24, %v876_v25 }
 0x13e   : > { %v3214_v28 = vpop.f32.mrf.mxu0  ;;  %v973_v29 = vpop.f32.mrf.mxu1 }
 0x13f   : > { %881 = vst.msk [vmem:[#allocation2 + $0x10] sm:$0xff] %vm495_vm1, %v877_v27  ;;  %v974_v30 = vadd.f32 %v2699_v26, %v973_v29 }
 0x140   : > { %v3249_v31 = vpop.f32.mrf.mxu1 }
 0x141   : > { %978 = vst.msk [vmem:[#allocation3 + $0x10] sm:$0xff] %vm495_vm1, %v974_v30 }
 0x146   : > { %v1566_v51 = vld [vmem:[#allocation2 + $0x10] sm:$0xff] }
 0x15e   : > { %v1070_v34 = vpop.f32.mrf.mxu0 }
 0x15f   : > { %v1071_v36 = vadd.f32 %v2717_v32, %v1070_v34 }
 0x160   : > { %v3284_v37 = vpop.f32.mrf.mxu0  ;;  %v1167_v38 = vpop.f32.mrf.mxu1 }
 0x161   : > { %1075 = vst.msk [vmem:[#allocation2 + $0x18] sm:$0xff] %vm495_vm1, %v1071_v36  ;;  %v1168_v39 = vadd.f32 %v2735_v35, %v1167_v38  ;;  %v1918_v38 = vld [vmem:[#allocation3 + $0x10] sm:$0xff] }
 0x162   : > { %v3319_v40 = vpop.f32.mrf.mxu1 }
 0x163   : > { %1172 = vst.msk [vmem:[#allocation3 + $0x18] sm:$0xff] %vm495_vm1, %v1168_v39 }
 0x168   : > { %v1567_v52 = vld [vmem:[#allocation2 + $0x18] sm:$0xff] }
 0x181   : > { %v1263_v43 = vpop.f32.mrf.mxu0  ;;  %v1360_v44 = vpop.f32.mrf.mxu1 }
 0x182   : > { %v1264_v45 = vadd.f32 %v2736_v41, %v1263_v43  ;;  %v1361_v46 = vadd.f32 %v2754_v42, %v1360_v44  ;;  %v1919_v41 = vld [vmem:[#allocation3 + $0x18] sm:$0xff] }
 0x183   : > { %v3354_v47 = vpop.f32.mrf.mxu0  ;;  %v3389_v48 = vpop.f32.mrf.mxu1 }
 0x184   : > { %1268 = vst.msk [vmem:[#allocation4] sm:$0xff] %vm495_vm1, %v1264_v45  ;;  %1365 = vst.msk [vmem:[#allocation4 + $0x8] sm:$0xff] %vm495_vm1, %v1361_v46  ;;  %v2212_v48 = vld [vmem:[%s4777_s8] sm:$0xff] }
 0x18b   : > { %v1560_v49 = vld [vmem:[#allocation4] sm:$0xff]  ;;  %v1561_v50 = vld [vmem:[#allocation4 + $0x8] sm:$0xff] }
 0x18c   : > { %3463 = vmatmul.mubr.msk.f32.vlgmr.msra.gmra.mxu0 %vm495_vm1, %v1560_v49  ;;  %3468 = vmatmul.mubr.msk.f32.vlgmr.msra.gmra.mxu1 %vm495_vm1, %v1561_v50  ;;  %v2213_v49 = vld [vmem:[%s4777_s8 + $0x8] sm:$0xff]  ;;  %v2214_v50 = vld [vmem:[%s4777_s8 + $0x10] sm:$0xff] }
 0x18d   : > { %3471 = vmatpush3.xpose.msk.msra.mxu0 %vm495_vm1, %v1566_v51  ;;  %3476 = vmatpush3.xpose.msk.msra.mxu1 %vm495_vm1, %v1567_v52 }
 0x18e   : > { %3472 = vmatprep.mubr.msk.f32.mxu0 %vm3672_vm0, %v3671_v2  ;;  %3477 = vmatprep.mubr.msk.f32.mxu1 %vm3672_vm0, %v3671_v2 }
 0x18f   : > { %3480 = vmatprep.subr.mxu0 %v3671_v2  ;;  %3485 = vmatprep.subr.mxu1 %v3671_v2 }
 0x1a3   : > { %v1457_v55 = vpop.f32.mrf.mxu0  ;;  %v1554_v56 = vpop.f32.mrf.mxu1 }
 0x1a4   : > { %v1458_v57 = vadd.f32 %v2772_v53, %v1457_v55  ;;  %v1555_v58 = vadd.f32 %v2790_v54, %v1554_v56  ;;  %v2215_v53 = vld [vmem:[%s4777_s8 + $0x18] sm:$0xff] }
 0x1a5   : > { %v3424_v59 = vpop.f32.mrf.mxu0  ;;  %v3459_v60 = vpop.f32.mrf.mxu1 }
 0x1a6   : > { %1462 = vst.msk [vmem:[#allocation4 + $0x10] sm:$0xff] %vm495_vm1, %v1458_v57  ;;  %1559 = vst.msk [vmem:[#allocation4 + $0x18] sm:$0xff] %vm495_vm1, %v1555_v58 }
 0x1ad   : > { %v1562_v61 = vld [vmem:[#allocation4 + $0x10] sm:$0xff]  ;;  %v1563_v62 = vld [vmem:[#allocation4 + $0x18] sm:$0xff] }
 0x1ae   : > { %3473 = vmatmul.mubr.msk.f32.vlgmr.msra.gmra.mxu0 %vm495_vm1, %v1562_v61  ;;  %3478 = vmatmul.mubr.msk.f32.vlgmr.msra.gmra.mxu1 %vm495_vm1, %v1563_v62 }
 0x1af   : > { %3481 = vmatpush3.msra.mxu0 %v1916_v63  ;;  %3486 = vmatpush3.msra.mxu1 %v1917_v0 }
 0x1b0   : > { %3482 = vmatprep.mubr.msk.f32.mxu0 %vm3672_vm0, %v3671_v2  ;;  %3490 = vmatprep.subr.mxu0 %v3671_v2 }
 0x1b1   : > { %3487 = vmatprep.mubr.msk.f32.mxu1 %vm3672_vm0, %v3671_v2  ;;  %3495 = vmatprep.subr.mxu1 %v3671_v2 }
 0x24c   : > { %v1640_v1 = vpop.f32.mrf.mxu0  ;;  %v1716_v3 = vpop.f32.mrf.mxu1 }
 0x24d   : > { %v1872_v4 = vsel %vm495_vm1, %v1640_v1, -inf  ;;  %v1875_v7 = vsel %vm495_vm1, %v1716_v3, -inf }
 0x24e   : > { %1873 = vmax.xlane.f32.xlu0 %v1872_v4  ;;  %v3464_v5 = vpop.f32.mrf.mxu0  ;;  %v3469_v6 = vpop.f32.mrf.mxu1 }
 0x24f   : > { %v2807_v5 = vld [vmem:[%s4778_s9] ss:$0 sm:$0xff] }
 0x252   : > { %1876 = vmax.xlane.f32.xlu0 %v1875_v7 }
 0x26e   : > { %v1792_v8 = vpop.f32.mrf.mxu0  ;;  %v1868_v9 = vpop.f32.mrf.mxu1 }
 0x26f   : > { %v1878_v33 = vsel %vm495_vm1, %v1792_v8, -inf  ;;  %v1881_v12 = vsel %vm495_vm1, %v1868_v9, -inf }
 0x270   : > { %1879 = vmax.xlane.f32.xlu1 %v1878_v33  ;;  %v3474_v10 = vpop.f32.mrf.mxu0  ;;  %v3479_v11 = vpop.f32.mrf.mxu1 }
 0x274   : > { %1882 = vmax.xlane.f32.xlu1 %v1881_v12 }
 0x2d7   : > { %v1874_v13 = vpop.xlane.xlu0 %1873 }
 0x2d8   : > { %v1884_v14 = vsub.f32 %v1640_v1, %v1874_v13 }
 0x2da   : > { %v1888_v15 = vmul.f32 1.442695, %v1884_v14 }
 0x2db   : > { %v1877_v16 = vpop.xlane.xlu0 %1876 }
 0x2dc   : > { %3577 = vpow2.f32 %v1888_v15  ;;  %v1885_v17 = vsub.f32 %v1716_v3, %v1877_v16 }
 0x2de   : > { %v1890_v18 = vmul.f32 1.442695, %v1885_v17 }
 0x2e0   : > { %3579 = vpow2.f32 %v1890_v18 }
 0x2e9   : > { %v3578_v19 = vpop.eup %3577 }
 0x2ea   : > { %v1896_v20 = vsel %vm495_vm1, %v3578_v19, 0.0 }
 0x2eb   : > { %1897 = vadd.xlane.f32.xlu0 %v1896_v20 }
 0x2ed   : > { %v3580_v21 = vpop.eup %3579 }
 0x2ee   : > { %v1899_v22 = vsel %vm495_vm1, %v3580_v21, 0.0 }
 0x2ef   : > { %1900 = vadd.xlane.f32.xlu1 %v1899_v22 }
 0x2f9   : > { %v1880_v23 = vpop.xlane.xlu1 %1879 }
 0x2fa   : > { %v1886_v24 = vsub.f32 %v1792_v8, %v1880_v23 }
 0x2fc   : > { %v1892_v25 = vmul.f32 1.442695, %v1886_v24 }
 0x2fd   : > { %v1883_v26 = vpop.xlane.xlu1 %1882 }
 0x2fe   : > { %3581 = vpow2.f32 %v1892_v25  ;;  %v1887_v27 = vsub.f32 %v1868_v9, %v1883_v26 }
 0x300   : > { %v1894_v28 = vmul.f32 1.442695, %v1887_v27 }
 0x302   : > { %3583 = vpow2.f32 %v1894_v28 }
 0x30b   : > { %v3582_v29 = vpop.eup %3581 }
 0x30c   : > { %v1902_v30 = vsel %vm495_vm1, %v3582_v29, 0.0 }
 0x30d   : > { %1903 = vadd.xlane.f32.xlu0 %v1902_v30 }
 0x30f   : > { %v3584_v31 = vpop.eup %3583 }
 0x310   : > { %v1905_v32 = vsel %vm495_vm1, %v3584_v31, 0.0 }
 0x311   : > { %1906 = vadd.xlane.f32.xlu1 %v1905_v32 }
 0x374   : > { %v1898_v34 = vpop.xlane.xlu0 %1897 }
 0x375   : > { %3585 = vrcp.f32 %v1898_v34 }
 0x378   : > { %v1901_v35 = vpop.xlane.xlu1 %1900 }
 0x379   : > { %3587 = vrcp.f32 %v1901_v35 }
 0x382   : > { %v3586_v36 = vpop.eup %3585 }
 0x383   : > { %v1912_v37 = vmul.f32 %v3586_v36, %v3578_v19 }
 0x385   : > { %3483 = vmatmul.mubr.msk.f32.vlgmr.msra.gmra.mxu0 %vm495_vm1, %v1912_v37 }
 0x386   : > { %v3588_v39 = vpop.eup %3587  ;;  %3491 = vmatpush3.msra.mxu0 %v1918_v38  ;;  %3492 = vmatprep.mubr.msk.f32.mxu0 %vm3672_vm0, %v3671_v2 }
 0x387   : > { %v1913_v40 = vmul.f32 %v3588_v39, %v3580_v21  ;;  %3500 = vmatprep.subr.mxu0 %v3671_v2 }
 0x389   : > { %3488 = vmatmul.mubr.msk.f32.vlgmr.msra.gmra.mxu1 %vm495_vm1, %v1913_v40 }
 0x38a   : > { %3496 = vmatpush3.msra.mxu1 %v1919_v41  ;;  %3497 = vmatprep.mubr.msk.f32.mxu1 %vm3672_vm0, %v3671_v2 }
 0x38b   : > { %3505 = vmatprep.subr.mxu1 %v3671_v2 }
 0x396   : > { %v1904_v42 = vpop.xlane.xlu0 %1903 }
 0x397   : > { %3589 = vrcp.f32 %v1904_v42 }
 0x39a   : > { %v1907_v43 = vpop.xlane.xlu1 %1906 }
 0x39b   : > { %3591 = vrcp.f32 %v1907_v43 }
 0x3a4   : > { %v3590_v44 = vpop.eup %3589 }
 0x3a5   : > { %v1914_v45 = vmul.f32 %v3590_v44, %v3582_v29 }
 0x3a7   : > { %3493 = vmatmul.mubr.msk.f32.vlgmr.msra.gmra.mxu0 %vm495_vm1, %v1914_v45 }
 0x3a8   : > { %v3592_v46 = vpop.eup %3591  ;;  %3502 = vmatprep.mubr.msk.f32.mxu0 %vm3672_vm0, %v3671_v2  ;;  %3501 = vmatpush3.msra.mxu0 %v2212_v48 }
 0x3a9   : > { %v1915_v47 = vmul.f32 %v3592_v46, %v3584_v31  ;;  %3510 = vmatprep.subr.mxu0 %v3671_v2 }
 0x3ab   : > { %3498 = vmatmul.mubr.msk.f32.vlgmr.msra.gmra.mxu1 %vm495_vm1, %v1915_v47 }
 0x3ac   : > { %3507 = vmatprep.mubr.msk.f32.mxu1 %vm3672_vm0, %v3671_v2  ;;  %3506 = vmatpush3.msra.mxu1 %v2213_v49 }
 0x3ad   : > { %3515 = vmatprep.subr.mxu1 %v3671_v2 }
 0x445   : > { %v1989_v51 = vpop.f32.mrf.mxu0 }
 0x446   : > { %3503 = vmatmul.mubr.msk.f32.vlgmr.msra.gmra.mxu0 %vm495_vm1, %v1989_v51 }
 0x447   : > { %v3484_v52 = vpop.f32.mrf.mxu0  ;;  %3511 = vmatpush3.msra.mxu0 %v2214_v50  ;;  %3512 = vmatprep.mubr.msk.f32.mxu0 %vm3672_vm0, %v3671_v2 }
 0x449   : > { %v2062_v54 = vpop.f32.mrf.mxu1 }
 0x44a   : > { %3508 = vmatmul.mubr.msk.f32.vlgmr.msra.gmra.mxu1 %vm495_vm1, %v2062_v54 }
 0x44b   : > { %v3489_v55 = vpop.f32.mrf.mxu1  ;;  %3516 = vmatpush3.msra.mxu1 %v2215_v53  ;;  %3517 = vmatprep.mubr.msk.f32.mxu1 %vm3672_vm0, %v3671_v2 }
 0x467   : > { %v2135_v56 = vpop.f32.mrf.mxu0 }
 0x468   : > { %3513 = vmatmul.mubr.msk.f32.vlgmr.msra.gmra.mxu0 %vm495_vm1, %v2135_v56 }
 0x469   : > { %v3494_v57 = vpop.f32.mrf.mxu0 }
 0x46b   : > { %v2208_v58 = vpop.f32.mrf.mxu1 }
 0x46c   : > { %3518 = vmatmul.mubr.msk.f32.vlgmr.msra.gmra.mxu1 %vm495_vm1, %v2208_v58 }
 0x46d   : > { %v3499_v59 = vpop.f32.mrf.mxu1 }
 0x506   : > { %v2285_v60 = vpop.f32.mrf.mxu0 }
 0x508   : > { %v3504_v61 = vpop.f32.mrf.mxu0 }
 0x50a   : > { %v2358_v62 = vpop.f32.mrf.mxu1 }
 0x50b   : > { %v2508_v1 = vadd.f32 %v2358_v62, %v2285_v60 }
 0x50c   : > { %v3509_v63 = vpop.f32.mrf.mxu1 }
 0x528   : > { %v2431_v0 = vpop.f32.mrf.mxu0 }
 0x529   : > { %v2509_v2 = vadd.f32 %v2508_v1, %v2431_v0 }
 0x52a   : > { %v3514_v3 = vpop.f32.mrf.mxu0 }
 0x52c   : > { %v2504_v4 = vpop.f32.mrf.mxu1 }
 0x52d   : > { %v2510_v6 = vadd.f32 %v2509_v2, %v2504_v4 }
 0x52e   : > { %v3519_v7 = vpop.f32.mrf.mxu1 }
 0x52f   : > { %v2518_v8 = vadd.f32 %v2807_v5, %v2510_v6 }
 0x531   : > { %2519 = vst [vmem:[%s385_s24] sm:$0xff] %v2518_v8 }
 0x532   : > { %3606 = shalt.err (!%p3603_p5)
}
 0x533   : > { %s3607_s20 = scalar_lea.hbm %s2533_s29, 128  ;;  %s3611_s24 = scalar_lea.hbm %s4779_s10, 256 }
 0x534   : > { %p3608_p6 = scmp.ne.s32.totalorder %s2533_s29, %s3607_s20  ;;  %p3612_p10 = scmp.lt.s32.totalorder %s2533_s29, %s4779_s10 }
 0x535   : > { %p3613_p11 = scmp.lt.s32.totalorder %s3611_s24, %s3607_s20 }
 0x536   : > { %p3609_p7 = pnand %p3608_p6, %p3769_p4 }
 0x537   : > { %p3614_p12 = por %p3613_p11, %p3612_p10 }
 0x538   : > { %p3610_p9 = pneg %p3609_p7 }
 0x53a   : > { %p3615_p13 = pnand %p3614_p12, %p3610_p9 }
 0x53c   : > { %3618 = shalt.err (!%p3615_p13)
}
 0x53d   : > { %3520 = dma.vmem_to_hbm [thread:$0]  (%p3769_p4), %s2536_s27, 128, %s2533_s29, %s2521_s12  }
 0x53e PF: > { %p3526_p0 = scmp.ge.s32.totalorder %s3669_s18, 2  ;;  %s2547_s0 = sand.u32 1, %s3649_s13  }
 0x53f   : > { %s2548_s22 = scalar_lea.sflag [#allocation6], %s2547_s0 }
 0x540   : > { %p3523_p1 = pnand %p3526_p0, %p3776_p8 }
 0x542   : > { %p3524_p2 = pneg %p3523_p1 }
 0x544   : > { %3644 = dma.done.wait (%p3524_p2), %s2548_s22, 128  }
 0x545   : > { %3646 = vsyncadd (%p3524_p2), %s2548_s22, 4294967168  ;;  %s23_s18 = sadd.s32 1, %s3669_s18   ;;  %s4786_s23 = sld [smem:[#allocation8_spill]] }
 0x546   : > { %p20_p3 = scmp.ge.s32.totalorder %s23_s18, 4   ;;  %s4787_s13 = smov %s3653_s14 }
 0x547   : > { %s4788_s14 = smov %s3657_s15  ;;  %s4789_s15 = smov %s3782_s26 }
 0x548   : > { %s4790_s16 = smov %s3665_s17  ;;  %22 = sbr.rel (!%p20_p3) target bundleno = 6 (0x6), region = 129 }
 0x54b   : > { %s4791_s17 = smov %s4786_s23 }
 0x54d   :  { %2553 = vsyncpa [#allocation6], 1 }
 0x54e   :  { %2555 = vsyncpa [#allocation6 + $0x1], 1 }

</bundles_post_ra>
